<compile_context>
chip_gen: v7x
topology: tpu7x:2x2x1
jax: 0.10.0
libtpu: 0.0.40
codegen_flags: <defaults>
</compile_context>

<pallas_src>
import jax
import jax.numpy as jnp
from jax.experimental import pallas as pl
from jax.experimental.pallas import tpu as pltpu


def sage_kernel(src_ref, dst_ref, x_ext_ref, x_tile_ref, w_cat_ref, b_cat_ref,
                o_ref):
    # src_ref: (E, 1) i32   dst_ref: (1, E) i32
    # x_ext_ref: (N, C_in+1) f32 = [x | 1]     x_tile_ref: (tN, C_in) f32
    # w_cat_ref: (2*C_in, C_out) f32 = [W_src^T ; W_dst^T]
    # b_cat_ref: (1, C_out) f32 = b_src + b_dst
    e = src_ref.shape[0]
    n = x_ext_ref.shape[0]
    c_in = x_tile_ref.shape[1]
    tile_n = o_ref.shape[0]
    row_base = pl.program_id(0) * tile_n

    # One-hots in bf16 (0/1 exactly representable) -> exact counts in f32 acc.
    # src_oh[e, m] = (m == src[e])            (N on lanes)
    src_oh = (jax.lax.broadcasted_iota(jnp.int32, (e, n), 1)
              == src_ref[...]).astype(jnp.bfloat16)              # (E, N)
    # dst_oh[r, e] = (row_base + r == dst[e])  -- restricted to this N tile.
    # NOTE: iota along axis 0 (node axis) — this was the bug before.
    dst_oh = ((jax.lax.broadcasted_iota(jnp.int32, (tile_n, e), 0) + row_base)
              == dst_ref[...]).astype(jnp.bfloat16)              # (tN, E)

    # Adjacency tile on the MXU (integer counts, exact at default precision).
    a_tile = jnp.dot(dst_oh, src_oh,
                     preferred_element_type=jnp.float32)         # (tN, N)

    # Fused aggregation: last column of A @ [x | 1] is the in-degree.
    agg_ext = jnp.dot(a_tile, x_ext_ref[...],
                      preferred_element_type=jnp.float32,
                      precision=jax.lax.Precision.HIGHEST)       # (tN, C_in+1)
    deg = agg_ext[:, c_in:c_in + 1]                              # (tN, 1)
    agg = agg_ext[:, :c_in] * pl.reciprocal(jnp.maximum(deg, 1.0), approx=False)

    # Fused linear: y = [agg | x] @ [W_src^T ; W_dst^T] + (b_src + b_dst)
    feat = jnp.concatenate([agg, x_tile_ref[...]], axis=1)       # (tN, 2*C_in)
    y = jnp.dot(feat, w_cat_ref[...],
                preferred_element_type=jnp.float32,
                precision=jax.lax.Precision.HIGHEST) + b_cat_ref[...]
    o_ref[...] = y.astype(o_ref.dtype)


def my_sage_conv(x, edge_index, w_src, b_src, w_dst, b_dst, *, tile_n=64):
    """x: (N, C_in) f32, edge_index: (2, E) int, nn.Linear-style weights."""
    n, c_in = x.shape
    c_out = w_src.shape[0]
    e = edge_index.shape[1]
    tile_n = min(tile_n, n)
    assert n % tile_n == 0 and tile_n % 8 == 0, "N must tile in multiples of 8"

    src = edge_index[0].astype(jnp.int32).reshape(e, 1)
    dst = edge_index[1].astype(jnp.int32).reshape(1, e)

    x_f32 = x.astype(jnp.float32)
    # [x | 1] so the degree comes out of the aggregation matmul for free.
    x_ext = jnp.concatenate([x_f32, jnp.ones((n, 1), jnp.float32)], axis=1)

    # Fused weights / pre-summed bias (host-side glue).
    w_cat = jnp.concatenate([w_src.T, w_dst.T], axis=0).astype(jnp.float32)
    b_cat = (b_src + b_dst).reshape(1, c_out).astype(jnp.float32)

    n_tiles = n // tile_n
    flops = 2 * n_tiles * (tile_n * e * n                  # adjacency build
                           + tile_n * n * (c_in + 1)       # aggregation
                           + tile_n * 2 * c_in * c_out)    # fused linear
    bytes_accessed = 4 * (x_ext.size + x_f32.size + w_cat.size + b_cat.size
                          + src.size + dst.size + n * c_out)

    return pl.pallas_call(
        sage_kernel,
        out_shape=jax.ShapeDtypeStruct((n, c_out), jnp.float32),
        grid_spec=pltpu.PrefetchScalarGridSpec(
            num_scalar_prefetch=0,
            grid=(n_tiles,),
            in_specs=[
                pl.BlockSpec((e, 1), lambda i: (0, 0)),             # src (resident)
                pl.BlockSpec((1, e), lambda i: (0, 0)),             # dst (resident)
                pl.BlockSpec((n, c_in + 1), lambda i: (0, 0)),      # [x|1] (resident)
                pl.BlockSpec((tile_n, c_in), lambda i: (i, 0)),     # x tile (lin_dst)
                pl.BlockSpec((2 * c_in, c_out), lambda i: (0, 0)),  # fused weights
                pl.BlockSpec((1, c_out), lambda i: (0, 0)),         # fused bias
            ],
            out_specs=pl.BlockSpec((tile_n, c_out), lambda i: (i, 0)),
        ),
        compiler_params=pltpu.CompilerParams(
            dimension_semantics=("parallel",),
            vmem_limit_bytes=32 * 1024 * 1024,
        ),
        cost_estimate=pl.CostEstimate(flops=flops, transcendentals=0,
                                      bytes_accessed=bytes_accessed),
    )(src, dst, x_ext, x_f32, w_cat, b_cat)


def reference(x, edge_index, w_src, b_src, w_dst, b_dst):
    n = x.shape[0]
    src, dst = edge_index[0], edge_index[1]
    x_j = x[src]
    sums = jax.ops.segment_sum(x_j, dst, num_segments=n)
    cnts = jax.ops.segment_sum(jnp.ones((edge_index.shape[1],), jnp.float32),
                               dst, num_segments=n)
    mean = sums / jnp.maximum(cnts, 1.0)[:, None]
    return mean @ w_src.T + b_src + x @ w_dst.T + b_dst


if __name__ == "__main__":
    key = jax.random.PRNGKey(0)
    # Small but tile-friendly shapes: node tiles of 64, lane-dense C_out=128.
    N, E, C_IN, C_OUT = 128, 256, 64, 128

    k_x, k_e0, k_e1, k_ws, k_bs, k_wd, k_bd = jax.random.split(key, 7)
    x = jax.random.normal(k_x, (N, C_IN), dtype=jnp.float32)
    edge_index = jnp.stack([
        jax.random.randint(k_e0, (E,), 0, N, dtype=jnp.int32),
        jax.random.randint(k_e1, (E,), 0, N, dtype=jnp.int32),
    ])

    # Deterministic nn.Linear-style init: U(-1/sqrt(fan_in), 1/sqrt(fan_in)).
    bound = 1.0 / (C_IN ** 0.5)
    w_src = jax.random.uniform(k_ws, (C_OUT, C_IN), jnp.float32, -bound, bound)
    b_src = jax.random.uniform(k_bs, (C_OUT,), jnp.float32, -bound, bound)
    w_dst = jax.random.uniform(k_wd, (C_OUT, C_IN), jnp.float32, -bound, bound)
    b_dst = jax.random.uniform(k_bd, (C_OUT,), jnp.float32, -bound, bound)

    out = my_sage_conv(x, edge_index, w_src, b_src, w_dst, b_dst, tile_n=64)
    out = jax.block_until_ready(out)

    ref = reference(x, edge_index, w_src, b_src, w_dst, b_dst)
    assert out.shape == (N, C_OUT)
    assert jnp.allclose(out, ref, atol=1e-3, rtol=1e-3), "mismatch vs reference"
    print("KERNEL_OK")
</pallas_src>

<mosaic_0001>
module attributes {stable_mosaic.version = 11 : i64} {
  func.func @sage_kernel(%arg0: i32, %arg1: memref<256x1xi32, #tpu.memory_space<vmem>>, %arg2: memref<1x256xi32, #tpu.memory_space<vmem>>, %arg3: memref<128x65xf32, #tpu.memory_space<vmem>>, %arg4: memref<64x64xf32, #tpu.memory_space<vmem>>, %arg5: memref<128x128xf32, #tpu.memory_space<vmem>>, %arg6: memref<1x128xf32, #tpu.memory_space<vmem>>, %arg7: memref<64x128xf32, #tpu.memory_space<vmem>>) attributes {dimension_semantics = [#tpu.dimension_semantics<parallel>], iteration_bounds = array<i64: 2>, scalar_prefetch = 0 : i64, scratch_operands = 0 : i64, tpu.core_type = #tpu.core_type<tc>, window_params = [{pipeline_mode = #tpu.pipeline_mode<synchronous>, transform_indices = @transform_0, window_bounds = array<i64: 256, 1>}, {pipeline_mode = #tpu.pipeline_mode<synchronous>, transform_indices = @transform_1, window_bounds = array<i64: 1, 256>}, {pipeline_mode = #tpu.pipeline_mode<synchronous>, transform_indices = @transform_2, window_bounds = array<i64: 128, 65>}, {transform_indices = @transform_3, window_bounds = array<i64: 64, 64>}, {pipeline_mode = #tpu.pipeline_mode<synchronous>, transform_indices = @transform_4, window_bounds = array<i64: 128, 128>}, {pipeline_mode = #tpu.pipeline_mode<synchronous>, transform_indices = @transform_5, window_bounds = array<i64: 1, 128>}, {transform_indices = @transform_6, window_bounds = array<i64: 64, 128>}]} {
    %c64_i32 = arith.constant 64 : i32
    %0 = arith.muli %arg0, %c64_i32 : i32
    %1 = tpu.iota {dimensions = array<i32: 1>} : vector<256x128xi32>
    %c0 = arith.constant 0 : index
    %c0_0 = arith.constant 0 : index
    %2 = vector.load %arg1[%c0, %c0_0] : memref<256x1xi32, #tpu.memory_space<vmem>>, vector<256x1xi32>
    %3 = vector.broadcast %2 : vector<256x1xi32> to vector<256x128xi32>
    %4 = arith.cmpi eq, %1, %3 : vector<256x128xi32>
    %5 = arith.extui %4 : vector<256x128xi1> to vector<256x128xi32>
    %6 = arith.sitofp %5 : vector<256x128xi32> to vector<256x128xf32>
    %7 = arith.truncf %6 : vector<256x128xf32> to vector<256x128xbf16>
    %8 = tpu.iota {dimensions = array<i32: 0>} : vector<64x256xi32>
    %9 = vector.broadcast %0 : i32 to vector<64x256xi32>
    %10 = arith.addi %8, %9 : vector<64x256xi32>
    %c0_1 = arith.constant 0 : index
    %c0_2 = arith.constant 0 : index
    %11 = vector.load %arg2[%c0_1, %c0_2] : memref<1x256xi32, #tpu.memory_space<vmem>>, vector<1x256xi32>
    %12 = vector.broadcast %11 : vector<1x256xi32> to vector<64x256xi32>
    %13 = arith.cmpi eq, %10, %12 : vector<64x256xi32>
    %14 = arith.extui %13 : vector<64x256xi1> to vector<64x256xi32>
    %15 = arith.sitofp %14 : vector<64x256xi32> to vector<64x256xf32>
    %16 = arith.truncf %15 : vector<64x256xf32> to vector<64x256xbf16>
    %cst = arith.constant dense<0.000000e+00> : vector<64x128xf32>
    %17 = tpu.matmul %16, %7, %cst {dimension_numbers = #tpu.dot_dimension_numbers<[1], [0], [0], [1], [0, 0, 1, 1], [], []>} : vector<64x256xbf16>, vector<256x128xbf16>, vector<64x128xf32> -> vector<64x128xf32>
    %c0_3 = arith.constant 0 : index
    %c0_4 = arith.constant 0 : index
    %18 = vector.load %arg3[%c0_3, %c0_4] : memref<128x65xf32, #tpu.memory_space<vmem>>, vector<128x65xf32>
    %cst_5 = arith.constant dense<0.000000e+00> : vector<64x65xf32>
    %19 = tpu.matmul %17, %18, %cst_5 {dimension_numbers = #tpu.dot_dimension_numbers<[1], [0], [0], [1], [0, 0, 1, 1], [], []>, precision = #tpu.contract_precision<fp32>} : vector<64x128xf32>, vector<128x65xf32>, vector<64x65xf32> -> vector<64x65xf32>
    %20 = vector.extract_strided_slice %19 {offsets = [0, 64], sizes = [64, 1], strides = [1, 1]} : vector<64x65xf32> to vector<64x1xf32>
    %21 = vector.extract_strided_slice %19 {offsets = [0, 0], sizes = [64, 64], strides = [1, 1]} : vector<64x65xf32> to vector<64x64xf32>
    %cst_6 = arith.constant 1.000000e+00 : f32
    %22 = vector.broadcast %cst_6 : f32 to vector<64x1xf32>
    %23 = arith.maximumf %20, %22 : vector<64x1xf32>
    %24 = tpu.reciprocal %23 : vector<64x1xf32> -> vector<64x1xf32>
    %25 = vector.broadcast %24 : vector<64x1xf32> to vector<64x64xf32>
    %26 = arith.mulf %21, %25 : vector<64x64xf32>
    %c0_7 = arith.constant 0 : index
    %c0_8 = arith.constant 0 : index
    %27 = vector.load %arg4[%c0_7, %c0_8] : memref<64x64xf32, #tpu.memory_space<vmem>>, vector<64x64xf32>
    %28 = tpu.concatenate %26, %27 in 1 : vector<64x64xf32>, vector<64x64xf32> -> vector<64x128xf32>
    %c0_9 = arith.constant 0 : index
    %c0_10 = arith.constant 0 : index
    %29 = vector.load %arg5[%c0_9, %c0_10] : memref<128x128xf32, #tpu.memory_space<vmem>>, vector<128x128xf32>
    %cst_11 = arith.constant dense<0.000000e+00> : vector<64x128xf32>
    %30 = tpu.matmul %28, %29, %cst_11 {dimension_numbers = #tpu.dot_dimension_numbers<[1], [0], [0], [1], [0, 0, 1, 1], [], []>, precision = #tpu.contract_precision<fp32>} : vector<64x128xf32>, vector<128x128xf32>, vector<64x128xf32> -> vector<64x128xf32>
    %c0_12 = arith.constant 0 : index
    %c0_13 = arith.constant 0 : index
    %31 = vector.load %arg6[%c0_12, %c0_13] : memref<1x128xf32, #tpu.memory_space<vmem>>, vector<1x128xf32>
    %32 = vector.broadcast %31 : vector<1x128xf32> to vector<64x128xf32>
    %33 = arith.addf %30, %32 : vector<64x128xf32>
    %c0_14 = arith.constant 0 : index
    %c0_15 = arith.constant 0 : index
    %34 = vector.load %arg7[%c0_14, %c0_15] : memref<64x128xf32, #tpu.memory_space<vmem>>, vector<64x128xf32>
    tpu.vector_store %arg7[%c0_14, %c0_15], %33 {strides = array<i32>} : memref<64x128xf32, #tpu.memory_space<vmem>>, vector<64x128xf32>,
    return
  }
  func.func @transform_0(%arg0: i32) -> (i32, i32) {
    %c0_i32 = arith.constant 0 : i32
    %c0_i32_0 = arith.constant 0 : i32
    %c0_i32_1 = arith.constant 0 : i32
    return %c0_i32, %c0_i32_0 : i32, i32
  }
  func.func @transform_1(%arg0: i32) -> (i32, i32) {
    %c0_i32 = arith.constant 0 : i32
    %c0_i32_0 = arith.constant 0 : i32
    %c0_i32_1 = arith.constant 0 : i32
    return %c0_i32, %c0_i32_0 : i32, i32
  }
  func.func @transform_2(%arg0: i32) -> (i32, i32) {
    %c0_i32 = arith.constant 0 : i32
    %c0_i32_0 = arith.constant 0 : i32
    %c0_i32_1 = arith.constant 0 : i32
    return %c0_i32, %c0_i32_0 : i32, i32
  }
  func.func @transform_3(%arg0: i32) -> (i32, i32) {
    %c0_i32 = arith.constant 0 : i32
    %c0_i32_0 = arith.constant 0 : i32
    return %arg0, %c0_i32 : i32, i32
  }
  func.func @transform_4(%arg0: i32) -> (i32, i32) {
    %c0_i32 = arith.constant 0 : i32
    %c0_i32_0 = arith.constant 0 : i32
    %c0_i32_1 = arith.constant 0 : i32
    return %c0_i32, %c0_i32_0 : i32, i32
  }
  func.func @transform_5(%arg0: i32) -> (i32, i32) {
    %c0_i32 = arith.constant 0 : i32
    %c0_i32_0 = arith.constant 0 : i32
    %c0_i32_1 = arith.constant 0 : i32
    return %c0_i32, %c0_i32_0 : i32, i32
  }
  func.func @transform_6(%arg0: i32) -> (i32, i32) {
    %c0_i32 = arith.constant 0 : i32
    %c0_i32_0 = arith.constant 0 : i32
    return %arg0, %c0_i32 : i32, i32
  }
}

</mosaic_0001>

<bundles_post_ra>
// kernel: tpu_custom_call.1
= control target key start
LH: loop header
LB: loop body
LE: loop exit
PB: predicated region body
PF: predicated region fallthrough
CT: control target
= control target key end

     0   :  { %11 = vsyncpa [#allocation3], 0  ;;  %s5784_s0 = inlined_call_operand.vmem [shape: s32[256,1], index: 0, kind: input, shape index: {}]   ;;  %s5785_s1 = inlined_call_operand.vmem [shape: s32[1,256], index: 1, kind: input, shape index: {}]   ;;  %s5786_s2 = inlined_call_operand.vmem [shape: f32[128,65], index: 2, kind: input, shape index: {}]   ;;  %s5787_s3 = inlined_call_operand.vmem [shape: f32[128,64], index: 3, kind: input, shape index: {}]   ;;  %s5788_s4 = inlined_call_operand.vmem [shape: f32[128,128], index: 4, kind: input, shape index: {}]   ;;  %s5789_s5 = inlined_call_operand.vmem [shape: f32[1,128], index: 5, kind: input, shape index: {}]   ;;  %s5790_s6 = inlined_call_operand.hbm [shape: f32[128,128], index: 6, kind: output, shape index: {}]  }
   0x1   :  { %13 = vsyncpa [#allocation3 + $0x1], 0  ;;  %s4391_s21 = smov 0   ;;  %s4393_s22 = smov 0  }
   0x2   :  { %s4395_s23 = smov 0   ;;  %s4397_s24 = smov 0  }
   0x3 LB: > { %s4412_s25 = sadd.s32 4294967295, %s4347_s24   ;;  %s2765_s26 = sadd.s32 4294967294, %s4347_s24   ;;  %s4347_s24 = sphi %s4397_s24, %s5880_s24   ;;  %s4343_s23 = sphi %s4395_s23, %s5879_s23   ;;  %s4339_s22 = sphi %s4393_s22, %s5878_s22   ;;  %s4335_s21 = sphi %s4391_s21, %s5877_s21  }
   0x4   : > { %s4416_s27 = sadd.s32 1, %s4347_s24   ;;  %s157_s28 = sadd.s32 1, %s4343_s23 }
   0x5   : > { %s154_s29 = ssub.s32 %s4347_s24, %s4416_s27  ;;  %p167_p0 = scmp.ne.s32.totalorder %s4343_s23, %s4339_s22 }
   0x6   : > { %p155_p1 = scmp.eq.s32.totalorder %s154_s29, 0  ;;  %p168_p2 = scmp.eq.s32.totalorder %s4412_s25, 1 }
   0x7   : > { %p173_p3 = scmp.ne.s32.totalorder %s4339_s22, %s4335_s21  ;;  %p174_p4 = scmp.eq.s32.totalorder %s2765_s26, 1 }
   0x8   : > { %s4427_s30 = scalar_select %p155_p1, %s4343_s23, %s157_s28  }
   0x9   : > { %p4429_p5 = por %p168_p2, %p167_p0  ;;  %p4433_p6 = por %p174_p4, %p173_p3 }
   0xa   : > { %p2768_p7 = scmp.ge.s32.totalorder %s4347_s24, 1  ;;  %p216_p8 = scmp.lt.s32.totalorder %s4347_s24, 3 }
   0xc   : > { %p217_p9 = pnand %p2768_p7, %p216_p8 }
   0xe   : > { %220 = sbr.rel (%p217_p9) target bundleno = 1366 (0x556), region = 44 }
  0x15   : > { %v273_v0 = vld [vmem:[%s5784_s0 + $0x80] sm:$0xff]  ;;  %v4349_v2 = vmov 0   ;;  %v274_v3 = vld [vmem:[%s5784_s0 + $0x88] sm:$0xff]  ;;  %v275_v5 = vld [vmem:[%s5784_s0 + $0x90] sm:$0xff]  ;;  %v255_v31 = vlaneseq  ;;  %s2772_s13 = sshll.u32 %s4412_s25, 6  ;;  %v5839_v63 = vmov 0 }
  0x16   : > { %v257_v1 = vld [vmem:[%s5784_s0] sm:$0xff]  ;;  %4266 = vset.pattern.permute.xlu1 %v4349_v2  ;;  %4265 = vset.pattern.permute.xlu0 %v4349_v2  ;;  %v258_v4 = vld [vmem:[%s5784_s0 + $0x8] sm:$0xff]  ;;  %v276_v6 = vld [vmem:[%s5784_s0 + $0x98] sm:$0xff]  ;;  %v506_v37 = vstv %s2772_s13  ;;  %v4350_v44 = vmov 1.0|1.0   ;;  %s2770_s29 = sshll.u32 %s4412_s25, 3 }
  0x17   : > { %338 = vperm.xlu0 %4265, %v273_v0   ;;  %290 = vperm.xlu1 %4266, %v257_v1   ;;  %v259_v7 = vld [vmem:[%s5784_s0 + $0x10] sm:$0xff]  ;;  %v260_v8 = vld [vmem:[%s5784_s0 + $0x18] sm:$0xff]  ;;  %v277_v9 = vld [vmem:[%s5784_s0 + $0xa0] sm:$0xff]  ;;  %v498_v34 = vshrl.u32 %v255_v31, 7  ;;  %p247_p10 = scmp.lt.s32.totalorder %s2770_s29, 15  ;;  %s4352_s26 = smov 64  }
  0x18   : > { %v278_v10 = vld [vmem:[%s5784_s0 + $0xa8] sm:$0xff]  ;;  %v261_v11 = vld [vmem:[%s5784_s0 + $0x20] sm:$0xff]  ;;  %v279_v13 = vld [vmem:[%s5784_s0 + $0xb0] sm:$0xff]  ;;  %s243_s11 = sand.u32 1, %s4339_s22   ;;  %s2875_s16 = sshll.u32 %s4412_s25, 10 }
  0x19   : > { %v262_v12 = vld [vmem:[%s5784_s0 + $0x28] sm:$0xff]  ;;  %v280_v14 = vld [vmem:[%s5784_s0 + $0xb8] sm:$0xff]  ;;  %v263_v15 = vld [vmem:[%s5784_s0 + $0x30] sm:$0xff]  ;;  %v499_v35 = vadd.s32 8, %v498_v34  ;;  %v522_v36 = vsub.s32 1, %v498_v34  ;;  %v518_v39 = vsub.s32 0, %v498_v34  ;;  %v507_v40 = vadd.s32 %v506_v37, %v498_v34  ;;  %s5737_s20 = scalar_lea.hbm %s5790_s6, %s2875_s16 }
  0x1a   : > { %v264_v16 = vld [vmem:[%s5784_s0 + $0x38] sm:$0xff]  ;;  %v281_v17 = vld [vmem:[%s5784_s0 + $0xc0] sm:$0xff]  ;;  %v282_v18 = vld [vmem:[%s5784_s0 + $0xc8] sm:$0xff]  ;;  %v500_v46 = vadd.s32 16, %v498_v34  ;;  %v501_v47 = vadd.s32 24, %v498_v34  ;;  %v502_v52 = vadd.s32 32, %v498_v34 }
  0x1b   : > { %341 = vperm.xlu0 %4265, %v274_v3   ;;  %293 = vperm.xlu1 %4266, %v258_v4   ;;  %v265_v19 = vld [vmem:[%s5784_s0 + $0x40] sm:$0xff]  ;;  %v266_v20 = vld [vmem:[%s5784_s0 + $0x48] sm:$0xff]  ;;  %v283_v21 = vld [vmem:[%s5784_s0 + $0xd0] sm:$0xff]  ;;  %v508_v41 = vadd.s32 %v506_v37, %v499_v35  ;;  %v503_v53 = vadd.s32 40, %v498_v34  ;;  %v504_v58 = vadd.s32 48, %v498_v34  ;;  %v505_v59 = vadd.s32 56, %v498_v34 }
  0x1c   : > { %v284_v22 = vld [vmem:[%s5784_s0 + $0xd8] sm:$0xff]  ;;  %v267_v23 = vld [vmem:[%s5784_s0 + $0x50] sm:$0xff]  ;;  %v285_v25 = vld [vmem:[%s5784_s0 + $0xe0] sm:$0xff]  ;;  %v509_v48 = vadd.s32 %v506_v37, %v500_v46  ;;  %v510_v49 = vadd.s32 %v506_v37, %v501_v47  ;;  %v511_v54 = vadd.s32 %v506_v37, %v502_v52  ;;  %s5882_s29 = smov (!%p247_p10, %s2770_s29), 15  ;;  %s2769_s14 = sshll.u32 %s243_s11, 6 }
  0x1d   : > { %v268_v24 = vld [vmem:[%s5784_s0 + $0x58] sm:$0xff]  ;;  %v286_v26 = vld [vmem:[%s5784_s0 + $0xe8] sm:$0xff]  ;;  %v269_v27 = vld [vmem:[%s5784_s0 + $0x60] sm:$0xff]  ;;  %v512_v55 = vadd.s32 %v506_v37, %v503_v53  ;;  %v513_v60 = vadd.s32 %v506_v37, %v504_v58  ;;  %v514_v61 = vadd.s32 %v506_v37, %v505_v59  ;;  %s2771_s9 = sshll.u32 %s5882_s29, 3  ;;  %s245_s15 = scalar_lea.vmem [#allocation2], %s2769_s14 }
  0x1e   : > { %v270_v28 = vld [vmem:[%s5784_s0 + $0x68] sm:$0xff]  ;;  %v287_v29 = vld [vmem:[%s5784_s0 + $0xf0] sm:$0xff]  ;;  %v288_v30 = vld [vmem:[%s5784_s0 + $0xf8] sm:$0xff]  ;;  %s5263_s12 = scalar_lea.vmem %s5787_s3, %s2771_s9  ;;  %s2703_s17 = sshll.u32 %s245_s15, 4  ;;  %s5739_s17 = int_to_ptr.vmem [resolvable:$true] %s2703_s17 }
  0x1f   : > { %344 = vperm.xlu0 %4265, %v275_v5   ;;  %347 = vperm.xlu1 %4266, %v276_v6   ;;  %v271_v32 = vld [vmem:[%s5784_s0 + $0x70] sm:$0xff]  ;;  %v272_v33 = vld [vmem:[%s5784_s0 + $0x78] sm:$0xff]  ;;  %v515_v38 = vld [vmem:[%s5785_s1] sm:$0x3]  ;;  %s5743_s25 = scalar_lea.sflag [#allocation3], %s243_s11  ;;  %s4353_s28 = smov [#allocation2]  }
  0x20   : > { %v523_v42 = vrot.slane %v515_v38, %v522_v36  ;;  %v519_v43 = vrot.slane %v515_v38, %v518_v39  ;;  %v4572_v0 = vld [vmem:[%s5786_s2] sm:$0xff]  ;;  %v4577_v1 = vld [vmem:[%s5786_s2 + $0x8] sm:$0xff]  ;;  %v4582_v2 = vld [vmem:[%s5786_s2 + $0x10] sm:$0xff]  ;;  %s4289_s29 = sshll.u32 %s4353_s28, 4  ;;  %s4290_s29 = int_to_ptr.vmem [resolvable:$false] %s4289_s29 }
  0x21   : > { %v662_v3 = vand.u32 4294901760, %v4572_v0  ;;  %v665_v4 = vand.u32 4294901760, %v4577_v1  ;;  %v4589_v5 = vld [vmem:[%s5786_s2 + $0x18] sm:$0xff]  ;;  %v668_v6 = vand.u32 4294901760, %v4582_v2  ;;  %v655_v45 = vld [vmem:[%s5786_s2 + $0x50] sm:$0xff]  ;;  %v657_v62 = vld [vmem:[%s5786_s2 + $0x60] sm:$0xff]  ;;  %p4292_p0 = scmp.lt.s32.totalorder %s5739_s17, %s4290_s29 }
  0x22   : > { %vm525_vm0 = vcmp.eq.s32.totalorder %v507_v40, %v523_v42  ;;  %vm527_vm1 = vcmp.eq.s32.totalorder %v508_v41, %v523_v42  ;;  %vm524_vm3 = vcmp.eq.s32.totalorder %v507_v40, %v519_v43  ;;  %vm526_vm4 = vcmp.eq.s32.totalorder %v508_v41, %v519_v43  ;;  %v656_v50 = vld [vmem:[%s5786_s2 + $0x58] sm:$0xff]  ;;  %s4291_s9 = scalar_lea.vmem %s4290_s29, 2048 }
  0x23   : > { %296 = vperm.xlu0 %4265, %v259_v7   ;;  %299 = vperm.xlu1 %4266, %v260_v8   ;;  %vm2853_vm2 = vmpackc.low %vm527_vm1, %vm525_vm0  ;;  %vm529_vm6 = vcmp.eq.s32.totalorder %v509_v48, %v523_v42  ;;  %vm531_vm7 = vcmp.eq.s32.totalorder %v510_v49, %v523_v42  ;;  %vm528_vm8 = vcmp.eq.s32.totalorder %v509_v48, %v519_v43  ;;  %v4595_v7 = vld [vmem:[%s5786_s2 + $0x20] sm:$0xff]  ;;  %v4600_v8 = vld [vmem:[%s5786_s2 + $0x28] sm:$0xff]  ;;  %v692_v51 = vand.u32 4294901760, %v655_v45 }
  0x24   : > { %2854 = vmatprep.mubr.msk.bf16.mxu0 %vm2853_vm2, %v4350_v44  ;;  %vm4541_vm5 = vmpackc.low %vm526_vm4, %vm524_vm3  ;;  %vm530_vm9 = vcmp.eq.s32.totalorder %v510_v49, %v519_v43  ;;  %vm533_vm12 = vcmp.eq.s32.totalorder %v511_v54, %v523_v42  ;;  %vm535_vm13 = vcmp.eq.s32.totalorder %v512_v55, %v523_v42  ;;  %vm532_vm14 = vcmp.eq.s32.totalorder %v511_v54, %v519_v43 }
  0x25   : > { %vm4545_vm10 = vmpackc.low %vm531_vm7, %vm529_vm6  ;;  %vm534_vm15 = vcmp.eq.s32.totalorder %v512_v55, %v519_v43  ;;  %vm537_vm2 = vcmp.eq.s32.totalorder %v513_v60, %v523_v42  ;;  %vm539_vm3 = vcmp.eq.s32.totalorder %v514_v61, %v523_v42  ;;  %vm536_vm4 = vcmp.eq.s32.totalorder %v513_v60, %v519_v43 }
  0x26   : > { %vm4549_vm11 = vmpackc.low %vm530_vm9, %vm528_vm8  ;;  %vm538_vm6 = vcmp.eq.s32.totalorder %v514_v61, %v519_v43  ;;  %v695_v56 = vand.u32 4294901760, %v656_v50 }
  0x27   : > { %350 = vperm.xlu0 %4265, %v277_v9   ;;  %353 = vperm.xlu1 %4266, %v278_v10   ;;  %vm4553_vm0 = vmpackc.low %vm535_vm13, %vm533_vm12  ;;  %v671_v9 = vand.u32 4294901760, %v4589_v5  ;;  %v4607_v10 = vpack.c.bf16 %v665_v4, %v662_v3 }
  0x28   : > { %vm4557_vm1 = vmpackc.low %vm534_vm15, %vm532_vm14  ;;  %v4747_v57 = vpack.c.bf16 %v695_v56, %v692_v51 }
  0x29   : > { %vm4561_vm7 = vmpackc.low %vm539_vm3, %vm537_vm2  ;;  %3733 = vmatprep.subr.bf16.mxu1 %v4607_v10 }
  0x2a   : > { %vm4565_vm8 = vmpackc.low %vm538_vm6, %vm536_vm4  ;;  %3735 = vmatpush3.bf16.msra.mxu1 %v4607_v10 }
  0x2b   : > { %302 = vperm.xlu0 %4265, %v261_v11   ;;  %305 = vperm.xlu1 %4266, %v262_v12   ;;  %v5840_v63 = vsel %vm4565_vm8, 4294967295, %v5839_v63  ;;  %v674_v11 = vand.u32 4294901760, %v4595_v7  ;;  %v677_v12 = vand.u32 4294901760, %v4600_v8 }
  0x2f   : > { %356 = vperm.xlu0 %4265, %v279_v13   ;;  %359 = vperm.xlu1 %4266, %v280_v14   ;;  %v4615_v13 = vpack.c.bf16 %v671_v9, %v668_v6  ;;  %v4620_v14 = vld [vmem:[%s5786_s2 + $0x30] sm:$0xff] }
  0x31   : > { %3737 = vmatprep.subr.bf16.mxu1 %v4615_v13 }
  0x32   : > { %3739 = vmatpush3.bf16.msra.mxu1 %v4615_v13 }
  0x33   : > { %308 = vperm.xlu0 %4265, %v263_v15   ;;  %311 = vperm.xlu1 %4266, %v264_v16   ;;  %v4625_v15 = vld [vmem:[%s5786_s2 + $0x38] sm:$0xff]  ;;  %v4634_v16 = vpack.c.bf16 %v677_v12, %v674_v11 }
  0x35   : > { %3741 = vmatprep.subr.bf16.mxu1 %v4634_v16 }
  0x36   : > { %3743 = vmatpush3.bf16.msra.mxu1 %v4634_v16 }
  0x37   : > { %362 = vperm.xlu0 %4265, %v281_v17   ;;  %365 = vperm.xlu1 %4266, %v282_v18   ;;  %v680_v17 = vand.u32 4294901760, %v4620_v14  ;;  %v683_v18 = vand.u32 4294901760, %v4625_v15 }
  0x3b   : > { %314 = vperm.xlu0 %4265, %v265_v19   ;;  %317 = vperm.xlu1 %4266, %v266_v20   ;;  %v4641_v19 = vld [vmem:[%s5786_s2 + $0x40] sm:$0xff]  ;;  %v4646_v20 = vld [vmem:[%s5786_s2 + $0x48] sm:$0xff] }
  0x3f   : > { %368 = vperm.xlu0 %4265, %v283_v21   ;;  %371 = vperm.xlu1 %4266, %v284_v22   ;;  %v4654_v21 = vpack.c.bf16 %v683_v18, %v680_v17  ;;  %v686_v22 = vand.u32 4294901760, %v4641_v19 }
  0x41   : > { %3745 = vmatprep.subr.bf16.mxu1 %v4654_v21 }
  0x42   : > { %3747 = vmatpush3.bf16.msra.mxu1 %v4654_v21 }
  0x43   : > { %320 = vperm.xlu0 %4265, %v267_v23   ;;  %323 = vperm.xlu1 %4266, %v268_v24   ;;  %v689_v23 = vand.u32 4294901760, %v4646_v20 }
  0x45   : > { %v4664_v24 = vpack.c.bf16 %v689_v23, %v686_v22 }
  0x47   : > { %374 = vperm.xlu0 %4265, %v285_v25   ;;  %377 = vperm.xlu1 %4266, %v286_v26  }
  0x48   : > { %3749 = vmatprep.subr.bf16.mxu1 %v4664_v24 }
  0x49   : > { %3751 = vmatpush3.bf16.msra.mxu1 %v4664_v24 }
  0x4a   : > { %3753 = vmatprep.subr.bf16.mxu1 %v4747_v57 }
  0x4b   : > { %326 = vperm.xlu0 %4265, %v269_v27   ;;  %329 = vperm.xlu1 %4266, %v270_v28   ;;  %v4670_v27 = vand.u32 127, %v255_v31 }
  0x4d   : > { %3755 = vmatpush3.bf16.msra.mxu1 %v4747_v57 }
  0x4f   : > { %380 = vperm.xlu0 %4265, %v287_v29   ;;  %383 = vperm.xlu1 %4266, %v288_v30  }
  0x53   : > { %332 = vperm.xlu0 %4265, %v271_v32   ;;  %335 = vperm.xlu1 %4266, %v272_v33  }
  0x96   : > { %v339_v25 = vpop.permute.xlu0 %338  ;;  %v291_v26 = vpop.permute.xlu1 %290 }
  0x97   : > { %vm385_vm9 = vcmp.eq.s32.totalorder %v4670_v27, %v291_v26  ;;  %vm401_vm14 = vcmp.eq.s32.totalorder %v4670_v27, %v339_v25 }
  0x9a   : > { %v342_v28 = vpop.permute.xlu0 %341  ;;  %v294_v29 = vpop.permute.xlu1 %293 }
  0x9b   : > { %vm402_vm12 = vcmp.eq.s32.totalorder %v4670_v27, %v342_v28  ;;  %vm386_vm13 = vcmp.eq.s32.totalorder %v4670_v27, %v294_v29  ;;  %v4762_v29 = vsub.f32 %v4572_v0, %v662_v3 }
  0x9c   : > { %vm2821_vm15 = vmpackc.low %vm386_vm13, %vm385_vm9 }
  0x9d   : > { %vm2837_vm2 = vmpackc.low %vm402_vm12, %vm401_vm14  ;;  %v825_v0 = vand.u32 4294901760, %v4762_v29 }
  0x9e   : > { %2876 = vmatprep.subr.msk.bf16.mxu0 %vm2837_vm2, %v4350_v44  ;;  %v345_v30 = vpop.permute.xlu0 %344  ;;  %v348_v32 = vpop.permute.xlu1 %347 }
  0x9f   : > { %vm403_vm3 = vcmp.eq.s32.totalorder %v4670_v27, %v345_v30  ;;  %vm404_vm4 = vcmp.eq.s32.totalorder %v4670_v27, %v348_v32  ;;  %2877 = vmatpush3.bf16.msk.msra.mxu0 %vm2821_vm15, %v4350_v44  ;;  %v4767_v30 = vsub.f32 %v4577_v1, %v665_v4  ;;  %v659_v32 = vld [vmem:[%s5786_s2 + $0x70] sm:$0xff]  ;;  %v826_v4 = vsub.f32 %v4762_v29, %v825_v0 }
  0xa0   : > { %vm2839_vm6 = vmpackc.low %vm404_vm4, %vm403_vm3 }
  0xa1   : > { %2878 = vmatprep.subr.msk.bf16.mxu0 %vm2839_vm6, %v4350_v44  ;;  %v832_v3 = vand.u32 4294901760, %v4767_v30 }
  0xa2   : > { %v297_v31 = vpop.permute.xlu0 %296  ;;  %v300_v33 = vpop.permute.xlu1 %299 }
  0xa3   : > { %vm387_vm8 = vcmp.eq.s32.totalorder %v4670_v27, %v297_v31  ;;  %vm388_vm9 = vcmp.eq.s32.totalorder %v4670_v27, %v300_v33  ;;  %v660_v31 = vld [vmem:[%s5786_s2 + $0x78] sm:$0xff]  ;;  %v704_v33 = vand.u32 4294901760, %v659_v32 }
  0xa4   : > { %vm2823_vm12 = vmpackc.low %vm388_vm9, %vm387_vm8 }
  0xa5   : > { %2879 = vmatpush3.bf16.msk.msra.mxu0 %vm2823_vm12, %v4350_v44 }
  0xa6   : > { %v351_v34 = vpop.permute.xlu0 %350  ;;  %v354_v35 = vpop.permute.xlu1 %353 }
  0xa7   : > { %vm405_vm13 = vcmp.eq.s32.totalorder %v4670_v27, %v351_v34  ;;  %vm406_vm14 = vcmp.eq.s32.totalorder %v4670_v27, %v354_v35  ;;  %v707_v34 = vand.u32 4294901760, %v660_v31  ;;  %v833_v35 = vsub.f32 %v4767_v30, %v832_v3 }
  0xa8   : > { %vm2841_vm2 = vmpackc.low %vm406_vm14, %vm405_vm13 }
  0xa9   : > { %2880 = vmatprep.subr.msk.bf16.mxu0 %vm2841_vm2, %v4350_v44  ;;  %v4779_v1 = vpack.c.bf16 %v707_v34, %v704_v33 }
  0xaa   : > { %v303_v36 = vpop.permute.xlu0 %302  ;;  %v306_v37 = vpop.permute.xlu1 %305 }
  0xab   : > { %vm389_vm15 = vcmp.eq.s32.totalorder %v4670_v27, %v303_v36  ;;  %vm390_vm3 = vcmp.eq.s32.totalorder %v4670_v27, %v306_v37  ;;  %v827_v36 = vand.u32 4294901760, %v826_v4  ;;  %v834_v37 = vand.u32 4294901760, %v833_v35 }
  0xac   : > { %vm2825_vm4 = vmpackc.low %vm390_vm3, %vm389_vm15  ;;  %v4853_v4 = vsub.f32 %v4582_v2, %v668_v6  ;;  %v4858_v35 = vsub.f32 %v4589_v5, %v671_v9  ;;  %v4870_v2 = vsub.f32 %v4600_v8, %v677_v12  ;;  %v4885_v8 = vsub.f32 %v4620_v14, %v680_v17 }
  0xad   : > { %2881 = vmatpush3.bf16.msk.msra.mxu0 %vm2825_vm4, %v4350_v44  ;;  %v4890_v12 = vsub.f32 %v4625_v15, %v683_v18 }
  0xae   : > { %v357_v38 = vpop.permute.xlu0 %356  ;;  %v360_v39 = vpop.permute.xlu1 %359  ;;  %v5798_v18 = vand.u32 4294901760, %v4885_v8 }
  0xaf   : > { %vm407_vm8 = vcmp.eq.s32.totalorder %v4670_v27, %v357_v38  ;;  %vm408_vm6 = vcmp.eq.s32.totalorder %v4670_v27, %v360_v39  ;;  %v4789_v38 = vpack.c.bf16 %v834_v37, %v827_v36  ;;  %v4792_v39 = vsub.f32 %v655_v45, %v692_v51 }
  0xb0   : > { %vm2843_vm9 = vmpackc.low %vm408_vm6, %vm407_vm8  ;;  %v5806_v36 = vand.u32 4294901760, %v4853_v4  ;;  %v5805_v37 = vand.u32 4294901760, %v4858_v35 }
  0xb1   : > { %2882 = vmatprep.subr.msk.bf16.mxu0 %vm2843_vm9, %v4350_v44 }
  0xb2   : > { %v309_v40 = vpop.permute.xlu0 %308  ;;  %v312_v41 = vpop.permute.xlu1 %311  ;;  %v840_v9 = vsub.f32 %v4853_v4, %v5806_v36 }
  0xb3   : > { %vm391_vm12 = vcmp.eq.s32.totalorder %v4670_v27, %v309_v40  ;;  %vm392_vm13 = vcmp.eq.s32.totalorder %v4670_v27, %v312_v41  ;;  %v4794_v40 = vsub.f32 %v656_v50, %v695_v56  ;;  %v5796_v41 = vand.u32 4294901760, %v4792_v39 }
  0xb4   : > { %vm2827_vm14 = vmpackc.low %vm392_vm13, %vm391_vm12 }
  0xb5   : > { %2883 = vmatpush3.bf16.msk.msra.mxu0 %vm2827_vm14, %v4350_v44 }
  0xb6   : > { %v363_v42 = vpop.permute.xlu0 %362  ;;  %v366_v43 = vpop.permute.xlu1 %365 }
  0xb7   : > { %vm409_vm2 = vcmp.eq.s32.totalorder %v4670_v27, %v363_v42  ;;  %vm410_vm15 = vcmp.eq.s32.totalorder %v4670_v27, %v366_v43  ;;  %v5795_v42 = vand.u32 4294901760, %v4794_v40  ;;  %v896_v43 = vsub.f32 %v4792_v39, %v5796_v41 }
  0xb8   : > { %vm2845_vm3 = vmpackc.low %vm410_vm15, %vm409_vm2  ;;  %v868_v41 = vsub.f32 %v4885_v8, %v5798_v18 }
  0xb9   : > { %2884 = vmatprep.subr.msk.bf16.mxu0 %vm2845_vm3, %v4350_v44 }
  0xba   : > { %v315_v46 = vpop.permute.xlu0 %314  ;;  %v318_v47 = vpop.permute.xlu1 %317 }
  0xbb   : > { %vm393_vm4 = vcmp.eq.s32.totalorder %v4670_v27, %v315_v46  ;;  %vm394_vm8 = vcmp.eq.s32.totalorder %v4670_v27, %v318_v47  ;;  %v903_v46 = vsub.f32 %v4794_v40, %v5795_v42 }
  0xbc   : > { %vm2829_vm6 = vmpackc.low %vm394_vm8, %vm393_vm4 }
  0xbd   : > { %2885 = vmatpush3.bf16.msk.msra.mxu0 %vm2829_vm6, %v4350_v44 }
  0xbe   : > { %v369_v48 = vpop.permute.xlu0 %368  ;;  %v372_v49 = vpop.permute.xlu1 %371 }
  0xbf   : > { %vm411_vm9 = vcmp.eq.s32.totalorder %v4670_v27, %v369_v48  ;;  %vm412_vm12 = vcmp.eq.s32.totalorder %v4670_v27, %v372_v49  ;;  %v897_v49 = vand.u32 4294901760, %v896_v43  ;;  %v4865_v43 = vsub.f32 %v4595_v7, %v674_v11 }
  0xc0   : > { %vm2847_vm13 = vmpackc.low %vm412_vm12, %vm411_vm9 }
  0xc1   : > { %2886 = vmatprep.subr.msk.bf16.mxu0 %vm2847_vm13, %v4350_v44  ;;  %v5800_v7 = vand.u32 4294901760, %v4865_v43 }
  0xc2   : > { %v321_v52 = vpop.permute.xlu0 %320  ;;  %v324_v53 = vpop.permute.xlu1 %323 }
  0xc3   : > { %vm395_vm14 = vcmp.eq.s32.totalorder %v4670_v27, %v321_v52  ;;  %vm396_vm2 = vcmp.eq.s32.totalorder %v4670_v27, %v324_v53  ;;  %v904_v52 = vand.u32 4294901760, %v903_v46 }
  0xc4   : > { %vm2831_vm15 = vmpackc.low %vm396_vm2, %vm395_vm14 }
  0xc5   : > { %2887 = vmatpush3.bf16.msk.msra.mxu0 %vm2831_vm15, %v4350_v44 }
  0xc6   : > { %v375_v54 = vpop.permute.xlu0 %374  ;;  %v378_v55 = vpop.permute.xlu1 %377 }
  0xc7   : > { %vm413_vm3 = vcmp.eq.s32.totalorder %v4670_v27, %v375_v54  ;;  %vm414_vm4 = vcmp.eq.s32.totalorder %v4670_v27, %v378_v55  ;;  %v4810_v55 = vpack.c.bf16 %v904_v52, %v897_v49 }
  0xc8   : > { %vm2849_vm8 = vmpackc.low %vm414_vm4, %vm413_vm3 }
  0xc9   : > { %2888 = vmatprep.subr.msk.bf16.mxu0 %vm2849_vm8, %v4350_v44 }
  0xca   : > { %v327_v58 = vpop.permute.xlu0 %326  ;;  %v330_v59 = vpop.permute.xlu1 %329 }
  0xcb   : > { %vm397_vm6 = vcmp.eq.s32.totalorder %v4670_v27, %v327_v58  ;;  %vm398_vm9 = vcmp.eq.s32.totalorder %v4670_v27, %v330_v59 }
  0xcc   : > { %vm2833_vm12 = vmpackc.low %vm398_vm9, %vm397_vm6 }
  0xcd   : > { %2889 = vmatpush3.bf16.msk.msra.mxu0 %vm2833_vm12, %v4350_v44 }
  0xce   : > { %v381_v60 = vpop.permute.xlu0 %380  ;;  %v384_v61 = vpop.permute.xlu1 %383 }
  0xcf   : > { %vm415_vm13 = vcmp.eq.s32.totalorder %v4670_v27, %v381_v60  ;;  %vm416_vm14 = vcmp.eq.s32.totalorder %v4670_v27, %v384_v61  ;;  %v4818_v60 = vsub.f32 %v659_v32, %v704_v33  ;;  %v4820_v61 = vsub.f32 %v660_v31, %v707_v34 }
  0xd0   : > { %vm2851_vm2 = vmpackc.low %vm416_vm14, %vm415_vm13  ;;  %v4836_v32 = vpack.c.bf16 %v4767_v30, %v4762_v29  ;;  %v4840_v31 = vpack.c.bf16 %v4794_v40, %v4792_v39  ;;  %v5846_v29 = vand.u32 4294901760, %v4865_v43  ;;  %v5847_v30 = vand.u32 4294901760, %v4870_v2 }
  0xd1   : > { %2890 = vmatprep.subr.msk.bf16.mxu0 %vm2851_vm2, %v4350_v44  ;;  %v5792_v45 = vand.u32 4294901760, %v4818_v60  ;;  %v5791_v50 = vand.u32 4294901760, %v4820_v61  ;;  %v4848_v34 = vpack.c.bf16 %v4820_v61, %v4818_v60 }
  0xd2   : > { %v333_v25 = vpop.permute.xlu0 %332  ;;  %v336_v26 = vpop.permute.xlu1 %335 }
  0xd3   : > { %vm399_vm15 = vcmp.eq.s32.totalorder %v4670_v27, %v333_v25  ;;  %vm400_vm3 = vcmp.eq.s32.totalorder %v4670_v27, %v336_v26  ;;  %v924_v56 = vsub.f32 %v4818_v60, %v5792_v45 }
  0xd4   : > { %vm2835_vm4 = vmpackc.low %vm400_vm3, %vm399_vm15 }
  0xd5   : > { %2891 = vmatpush3.bf16.msk.msra.mxu0 %vm2835_vm4, %v4350_v44 }
  0xd8   : > { %2856 = vmatmul.mubr.msk.bf16.vlgmr.msra.gmra.mrb[0].mxu0 %vm4541_vm5, %v4350_v44  ;;  %vm5841_vm5 = vnez %v5840_v63  ;;  %v698_v63 = vand.u32 4294901760, %v657_v62 }
  0xd9   : > { %2858 = vmatprep.mubr.msk.bf16.mxu0 %vm4545_vm10, %v4350_v44  ;;  %vm1707_vm10 = vcmask 523264  }
  0xda   : > { %v4804_v47 = vsub.f32 %v657_v62, %v698_v63  ;;  %v931_v62 = vsub.f32 %v4820_v61, %v5791_v50  ;;  %v4921_v50 = vsub.f32 %v4646_v20, %v689_v23 }
  0xdc   : > { %v5794_v53 = vand.u32 4294901760, %v4804_v47 }
  0xde   : > { %v910_v58 = vsub.f32 %v4804_v47, %v5794_v53 }
  0xe0   : > { %2860 = vmatmul.mubr.msk.bf16.gmra.mrb[4].mxu0 %vm4549_vm11, %v4350_v44  ;;  %v911_v25 = vand.u32 4294901760, %v910_v58  ;;  %v847_v58 = vsub.f32 %v4858_v35, %v5805_v37 }
  0xe1   : > { %2862 = vmatprep.mubr.msk.bf16.mxu0 %vm4553_vm0, %v4350_v44 }
  0xe8   : > { %2864 = vmatmul.mubr.msk.bf16.gmra.mrb[8].mxu0 %vm4557_vm1, %v4350_v44 }
  0xe9   : > { %2866 = vmatprep.mubr.msk.bf16.mxu0 %vm4561_vm7, %v4350_v44 }
  0xf0   : > { %2868 = vmatmul.mubr.msk.bf16.gmra.mrb[12].mxu0 %vm5841_vm5, %v4350_v44  ;;  %v658_v44 = vld [vmem:[%s5786_s2 + $0x68] sm:$0xff] }
  0xf1   : > { %v701_v27 = vand.u32 4294901760, %v658_v44 }
  0xf3   : > { %v4757_v28 = vpack.c.bf16 %v701_v27, %v698_v63  ;;  %v4806_v48 = vsub.f32 %v658_v44, %v701_v27  ;;  %v925_v44 = vand.u32 4294901760, %v924_v56  ;;  %v932_v63 = vand.u32 4294901760, %v931_v62 }
  0xf4   : > { %v841_v62 = vand.u32 4294901760, %v840_v9 }
  0xf5   : > { %3757 = vmatprep.subr.bf16.mxu1 %v4757_v28  ;;  %v5793_v54 = vand.u32 4294901760, %v4806_v48  ;;  %v4832_v27 = vpack.c.bf16 %v932_v63, %v925_v44  ;;  %v4844_v33 = vpack.c.bf16 %v4806_v48, %v4804_v47  ;;  %v848_v44 = vand.u32 4294901760, %v847_v58 }
  0xf6   : > { %3759 = vmatpush3.bf16.msra.mxu1 %v4757_v28  ;;  %v854_v63 = vsub.f32 %v4865_v43, %v5800_v7 }
  0xf7   : > { %3761 = vmatprep.subr.bf16.mxu1 %v4779_v1  ;;  %v917_v59 = vsub.f32 %v4806_v48, %v5793_v54  ;;  %v3768_v54 = vpack.c.bf16 %v848_v44, %v841_v62 }
  0xf8   : > { %v855_v53 = vand.u32 4294901760, %v854_v63  ;;  %v5804_v63 = vand.u32 4294901760, %v4921_v50 }
  0xf9   : > { %v918_v26 = vand.u32 4294901760, %v917_v59 }
  0xfa   : > { %3763 = vmatpush3.bf16.msra.mxu1 %v4779_v1 }
  0xfb   : > { %3765 = vmatprep.subr.bf16.mxu1 %v4789_v38  ;;  %v4824_v51 = vpack.c.bf16 %v918_v26, %v911_v25  ;;  %v5799_v25 = vand.u32 4294901760, %v4870_v2 }
  0xfd   : > { %v861_v15 = vsub.f32 %v4870_v2, %v5799_v25  ;;  %v869_v25 = vand.u32 4294901760, %v868_v41 }
 0x1ab   : > { %v2892_v46 = vpop.f32.mrb[0].mxu0 }
 0x1ac   : > { %v2893_v49 = vpop.f32.mrb[1].mxu0 }
 0x1ad   : > { %v2894_v6 = vadd.f32 %v2893_v49, %v2892_v46  ;;  %v2895_v52 = vpop.f32.mrb[2].mxu0 }
 0x1ae   : > { %v2896_v5 = vpop.f32.mrb[3].mxu0 }
 0x1af   : > { %v4879_v11 = vand.u32 4294901760, %v2894_v6  ;;  %v2897_v59 = vadd.f32 %v2896_v5, %v2895_v52  ;;  %v4912_v52 = vsub.f32 %v4641_v19, %v686_v22 }
 0x1b1   : > { %v4893_v26 = vsub.f32 %v2894_v6, %v4879_v11  ;;  %v4895_v56 = vand.u32 4294901760, %v2897_v59  ;;  %v5797_v6 = vand.u32 4294901760, %v4890_v12  ;;  %v5801_v23 = vand.u32 4294901760, %v4912_v52 }
 0x1b3   : > { %v4901_v46 = vsub.f32 %v2897_v59, %v4895_v56  ;;  %v2898_v14 = vpop.f32.mrb[4].mxu0  ;;  %v744_v17 = vand.u32 4294901760, %v4893_v26  ;;  %v875_v20 = vsub.f32 %v4890_v12, %v5797_v6 }
 0x1b4   : > { %v2899_v49 = vpop.f32.mrb[5].mxu0 }
 0x1b5   : > { %v2900_v5 = vadd.f32 %v2899_v49, %v2898_v14  ;;  %v2901_v9 = vpop.f32.mrb[6].mxu0  ;;  %v745_v58 = vsub.f32 %v4893_v26, %v744_v17  ;;  %v5803_v59 = vand.u32 4294901760, %v4901_v46  ;;  %v862_v49 = vand.u32 4294901760, %v861_v15 }
 0x1b6   : > { %v2902_v45 = vpop.f32.mrb[7].mxu0 }
 0x1b7   : > { %v4923_v42 = vand.u32 4294901760, %v2900_v5  ;;  %v2903_v19 = vadd.f32 %v2902_v45, %v2901_v9  ;;  %v746_v22 = vand.u32 4294901760, %v745_v58  ;;  %v755_v14 = vsub.f32 %v4901_v46, %v5803_v59 }
 0x1b8   : > { %v3772_v18 = vpack.c.bf16 %v862_v49, %v855_v53 }
 0x1b9   : > { %v4936_v62 = vsub.f32 %v2900_v5, %v4923_v42  ;;  %v4938_v45 = vand.u32 4294901760, %v2903_v19  ;;  %3236 = vmatprep.mubr.f32.mxu1 %v746_v22  ;;  %v756_v44 = vand.u32 4294901760, %v755_v14  ;;  %v876_v5 = vand.u32 4294901760, %v875_v20 }
 0x1ba   : > { %v882_v22 = vsub.f32 %v4912_v52, %v5801_v23 }
 0x1bb   : > { %v4942_v15 = vsub.f32 %v2903_v19, %v4938_v45  ;;  %v2904_v9 = vpop.f32.mrb[8].mxu0  ;;  %3237 = vmatmul.mubr.f32.vlgmr.msra.gmra.mrb[0].mxu1 %v756_v44  ;;  %v5802_v58 = vand.u32 4294901760, %v4936_v62 }
 0x1bc   : > { %3767 = vmatpush3.bf16.msra.mxu1 %v4789_v38  ;;  %v2905_v6 = vpop.f32.mrb[9].mxu0  ;;  %v889_v38 = vsub.f32 %v4921_v50, %v5804_v63  ;;  %v883_v23 = vand.u32 4294901760, %v882_v22 }
 0x1bd   : > { %v2906_v14 = vadd.f32 %v2905_v6, %v2904_v9  ;;  %v2907_v7 = vpop.f32.mrb[10].mxu0  ;;  %3769 = vmatprep.subr.bf16.mxu1 %v3768_v54  ;;  %v765_v19 = vsub.f32 %v4936_v62, %v5802_v58  ;;  %v774_v44 = vand.u32 4294901760, %v4942_v15  ;;  %v3776_v9 = vpack.c.bf16 %v876_v5, %v869_v25 }
 0x1be   : > { %v2908_v53 = vpop.f32.mrb[11].mxu0  ;;  %v890_v37 = vand.u32 4294901760, %v889_v38 }
 0x1bf   : > { %v4956_v41 = vand.u32 4294901760, %v2906_v14  ;;  %v2909_v49 = vadd.f32 %v2908_v53, %v2907_v7  ;;  %v766_v20 = vand.u32 4294901760, %v765_v19  ;;  %v775_v6 = vsub.f32 %v4942_v15, %v774_v44 }
 0x1c0   : > { %3771 = vmatpush3.bf16.msra.mxu1 %v3768_v54 }
 0x1c1   : > { %v4962_v58 = vsub.f32 %v2906_v14, %v4956_v41  ;;  %v4964_v59 = vand.u32 4294901760, %v2909_v49  ;;  %3239 = vmatprep.mubr.f32.mxu1 %v766_v20  ;;  %3773 = vmatprep.subr.bf16.mxu1 %v3772_v18  ;;  %v776_v63 = vand.u32 4294901760, %v775_v6  ;;  %v3780_v14 = vpack.c.bf16 %v890_v37, %v883_v23 }
 0x1c3   : > { %v4967_v36 = vsub.f32 %v2909_v49, %v4964_v59  ;;  %v2910_v7 = vpop.f32.mrb[12].mxu0  ;;  %3240 = vmatmul.mubr.f32.gmra.mrb[2].mxu1 %v776_v63  ;;  %v784_v19 = vand.u32 4294901760, %v4962_v58 }
 0x1c4   : > { %3775 = vmatpush3.bf16.msra.mxu1 %v3772_v18  ;;  %v2911_v54 = vpop.f32.mrb[13].mxu0 }
 0x1c5   : > { %v2912_v25 = vadd.f32 %v2911_v54, %v2910_v7  ;;  %v2913_v5 = vpop.f32.mrb[14].mxu0  ;;  %3777 = vmatprep.subr.bf16.mxu1 %v3776_v9  ;;  %v785_v22 = vsub.f32 %v4962_v58, %v784_v19  ;;  %v794_v53 = vand.u32 4294901760, %v4967_v36 }
 0x1c6   : > { %v2914_v38 = vpop.f32.mrb[15].mxu0 }
 0x1c7   : > { %v4974_v20 = vand.u32 4294901760, %v2912_v25  ;;  %v2915_v49 = vadd.f32 %v2914_v38, %v2913_v5  ;;  %v786_v6 = vand.u32 4294901760, %v785_v22  ;;  %v795_v18 = vsub.f32 %v4967_v36, %v794_v53 }
 0x1c8   : > { %3779 = vmatpush3.bf16.msra.mxu1 %v3776_v9 }
 0x1c9   : > { %v4980_v63 = vsub.f32 %v2912_v25, %v4974_v20  ;;  %v4982_v7 = vand.u32 4294901760, %v2915_v49  ;;  %3242 = vmatprep.mubr.f32.mxu1 %v786_v6  ;;  %3781 = vmatprep.subr.bf16.mxu1 %v3780_v14  ;;  %v796_v37 = vand.u32 4294901760, %v795_v18 }
 0x1cb   : > { %v4985_v23 = vsub.f32 %v2915_v49, %v4982_v7  ;;  %3243 = vmatmul.mubr.f32.gmra.mrb[4].mxu1 %v796_v37  ;;  %v804_v54 = vand.u32 4294901760, %v4980_v63 }
 0x1cc   : > { %3783 = vmatpush3.bf16.msra.mxu1 %v3780_v14  ;;  %v3800_v14 = vpack.c.bf16 %v4858_v35, %v4853_v4 }
 0x1cd   : > { %3785 = vmatprep.subr.bf16.mxu1 %v4810_v55  ;;  %v805_v9 = vsub.f32 %v4980_v63, %v804_v54  ;;  %v814_v25 = vand.u32 4294901760, %v4985_v23 }
 0x1cf   : > { %v806_v5 = vand.u32 4294901760, %v805_v9  ;;  %v815_v22 = vsub.f32 %v4985_v23, %v814_v25 }
 0x1d0   : > { %3787 = vmatpush3.bf16.msra.mxu1 %v4810_v55  ;;  %v3804_v55 = vpack.c.bf16 %v4870_v2, %v4865_v43  ;;  %v5850_v43 = vand.u32 4294901760, %v4912_v52  ;;  %v5851_v2 = vand.u32 4294901760, %v4921_v50 }
 0x1d1   : > { %3245 = vmatprep.mubr.f32.mxu1 %v806_v5  ;;  %3789 = vmatprep.subr.bf16.mxu1 %v4824_v51  ;;  %v816_v38 = vand.u32 4294901760, %v815_v22 }
 0x1d3   : > { %3246 = vmatmul.mubr.f32.gmra.mrb[6].mxu1 %v816_v38 }
 0x1d4   : > { %3791 = vmatpush3.bf16.msra.mxu1 %v4824_v51  ;;  %3280 = vmatprep.mubr.f32.mxu1 %v4879_v11  ;;  %v3808_v51 = vpack.c.bf16 %v4890_v12, %v4885_v8 }
 0x1d5   : > { %3793 = vmatprep.subr.bf16.mxu1 %v4832_v27 }
 0x1d8   : > { %3795 = vmatpush3.bf16.msra.mxu1 %v4832_v27  ;;  %v3812_v27 = vpack.c.bf16 %v4921_v50, %v4912_v52  ;;  %v5855_v52 = vand.u32 4294901760, %v4806_v48 }
 0x1d9   : > { %3797 = vmatprep.subr.bf16.mxu1 %v4836_v32 }
 0x1db   : > { %3281 = vmatmul.mubr.f32.vlgmr.msra.gmra.mrb[0].mxu1 %v4895_v56 }
 0x1dc   : > { %3283 = vmatprep.mubr.f32.mxu1 %v4923_v42  ;;  %3799 = vmatpush3.bf16.msra.mxu1 %v4836_v32  ;;  %v3860_v32 = vpack.c.bf16 %v832_v3, %v825_v0  ;;  %v3868_v0 = vpack.c.bf16 %v5847_v30, %v5846_v29  ;;  %v5848_v3 = vand.u32 4294901760, %v4885_v8  ;;  %v5853_v8 = vand.u32 4294901760, %v4794_v40  ;;  %v5160_v40 = vld [vmem:[%s5788_s4 + $0x28] sm:$0xff]  ;;  %v1667_v30 = vld [vmem:[%s5263_s12] sm:$0xff] }
 0x1dd   : > { %3801 = vmatprep.subr.bf16.mxu1 %v3800_v14 }
 0x1df   : > { %3284 = vmatmul.mubr.f32.gmra.mrb[2].mxu1 %v4938_v45 }
 0x1e0   : > { %3286 = vmatprep.mubr.f32.mxu1 %v4956_v41  ;;  %3803 = vmatpush3.bf16.msra.mxu1 %v3800_v14 }
 0x1e1   : > { %3805 = vmatprep.subr.bf16.mxu1 %v3804_v55 }
 0x1e3   : > { %3287 = vmatmul.mubr.f32.gmra.mrb[4].mxu1 %v4964_v59 }
 0x1e4   : > { %3289 = vmatprep.mubr.f32.mxu1 %v4974_v20  ;;  %3807 = vmatpush3.bf16.msra.mxu1 %v3804_v55 }
 0x1e5   : > { %3809 = vmatprep.subr.bf16.mxu1 %v3808_v51 }
 0x1e7   : > { %3290 = vmatmul.mubr.f32.gmra.mrb[6].mxu1 %v4982_v7 }
 0x1e8   : > { %3811 = vmatpush3.bf16.msra.mxu1 %v3808_v51  ;;  %3324 = vmatprep.mubr.f32.mxu1 %v4893_v26  ;;  %v5844_v26 = vand.u32 4294901760, %v4901_v46 }
 0x1e9   : > { %3813 = vmatprep.subr.bf16.mxu1 %v3812_v27 }
 0x1ec   : > { %3815 = vmatpush3.bf16.msra.mxu1 %v3812_v27  ;;  %v5268_v27 = vld [vmem:[%s5788_s4 + $0x50] sm:$0xff] }
 0x1ed   : > { %3817 = vmatprep.subr.bf16.mxu1 %v4840_v31 }
 0x1f0   : > { %3819 = vmatpush3.bf16.msra.mxu1 %v4840_v31  ;;  %v5842_v31 = vand.u32 4294901760, %v4853_v4  ;;  %v5849_v4 = vand.u32 4294901760, %v4890_v12 }
 0x1f1   : > { %3821 = vmatprep.subr.bf16.mxu1 %v4844_v33 }
 0x1f4   : > { %3823 = vmatpush3.bf16.msra.mxu1 %v4844_v33  ;;  %v5843_v33 = vand.u32 4294901760, %v4858_v35  ;;  %v3872_v35 = vpack.c.bf16 %v5849_v4, %v5848_v3  ;;  %v1668_v4 = vld [vmem:[%s5263_s12 + $0x8] sm:$0xff] }
 0x1f5   : > { %3825 = vmatprep.subr.bf16.mxu1 %v4848_v34 }
 0x1f8   : > { %3827 = vmatpush3.bf16.msra.mxu1 %v4848_v34  ;;  %v3864_v34 = vpack.c.bf16 %v5843_v33, %v5842_v31 }
 0x1f9   : > { %3829 = vmatprep.subr.bf16.mxu1 %v4607_v10 }
 0x1fb   : > { %3325 = vmatmul.mubr.f32.vlgmr.msra.gmra.mrb[0].mxu1 %v4901_v46  ;;  %v3876_v46 = vpack.c.bf16 %v5851_v2, %v5850_v43  ;;  %v5297_v43 = vld [vmem:[%s5788_s4 + $0x68] sm:$0xff] }
 0x1fc   : > { %3327 = vmatprep.mubr.f32.mxu1 %v4936_v62  ;;  %3831 = vmatpush3.bf16.msra.mxu1 %v4607_v10 }
 0x1fd   : > { %3833 = vmatprep.subr.bf16.mxu1 %v4615_v13 }
 0x1ff   : > { %3328 = vmatmul.mubr.f32.gmra.mrb[2].mxu1 %v4942_v15  ;;  %v5856_v15 = vand.u32 4294901760, %v4818_v60  ;;  %v1755_v60 = vand.u32 4294901760, %v5160_v40 }
 0x200   : > { %3330 = vmatprep.mubr.f32.mxu1 %v4962_v58  ;;  %3835 = vmatpush3.bf16.msra.mxu1 %v4615_v13  ;;  %v5857_v58 = vand.u32 4294901760, %v4820_v61 }
 0x201   : > { %3837 = vmatprep.subr.bf16.mxu1 %v4634_v16 }
 0x203   : > { %3331 = vmatmul.mubr.f32.gmra.mrb[4].mxu1 %v4967_v36  ;;  %v5852_v36 = vand.u32 4294901760, %v4792_v39  ;;  %v5155_v39 = vld [vmem:[%s5788_s4 + $0x20] sm:$0xff] }
 0x204   : > { %3333 = vmatprep.mubr.f32.mxu1 %v4980_v63  ;;  %3839 = vmatpush3.bf16.msra.mxu1 %v4634_v16  ;;  %v1752_v48 = vand.u32 4294901760, %v5155_v39 }
 0x205   : > { %3841 = vmatprep.subr.bf16.mxu1 %v4654_v21  ;;  %v3880_v12 = vpack.c.bf16 %v5853_v8, %v5852_v36 }
 0x207   : > { %3334 = vmatmul.mubr.f32.gmra.mrb[6].mxu1 %v4985_v23 }
 0x208   : > { %3843 = vmatpush3.bf16.msra.mxu1 %v4654_v21  ;;  %3368 = vmatprep.mubr.f32.mxu1 %v744_v17  ;;  %v5845_v17 = vand.u32 4294901760, %v4936_v62  ;;  %v5854_v62 = vand.u32 4294901760, %v4804_v47 }
 0x209   : > { %3845 = vmatprep.subr.bf16.mxu1 %v4664_v24 }
 0x20a   : > { %v3884_v50 = vpack.c.bf16 %v5855_v52, %v5854_v62  ;;  %v1730_v62 = vld [vmem:[%s5788_s4 + $0x70] sm:$0xff]  ;;  %v1731_v52 = vld [vmem:[%s5788_s4 + $0x78] sm:$0xff] }
 0x20c   : > { %3847 = vmatpush3.bf16.msra.mxu1 %v4664_v24 }
 0x20d   : > { %3849 = vmatprep.subr.bf16.mxu1 %v4747_v57 }
 0x210   : > { %3851 = vmatpush3.bf16.msra.mxu1 %v4747_v57 }
 0x211   : > { %3853 = vmatprep.subr.bf16.mxu1 %v4757_v28 }
 0x214   : > { %3855 = vmatpush3.bf16.msra.mxu1 %v4757_v28 }
 0x215   : > { %3857 = vmatprep.subr.bf16.mxu1 %v4779_v1 }
 0x218   : > { %3859 = vmatpush3.bf16.msra.mxu1 %v4779_v1 }
 0x219   : > { %3861 = vmatprep.subr.bf16.mxu1 %v3860_v32 }
 0x21b   : > { %3369 = vmatmul.mubr.f32.vlgmr.msra.gmra.mrb[0].mxu1 %v5844_v26 }
 0x21c   : > { %3371 = vmatprep.mubr.f32.mxu1 %v5845_v17  ;;  %3863 = vmatpush3.bf16.msra.mxu1 %v3860_v32  ;;  %v5273_v32 = vld [vmem:[%s5788_s4 + $0x58] sm:$0xff] }
 0x21d   : > { %3865 = vmatprep.subr.bf16.mxu1 %v3864_v34  ;;  %v1773_v26 = vand.u32 4294901760, %v5273_v32 }
 0x21f   : > { %3372 = vmatmul.mubr.f32.gmra.mrb[2].mxu1 %v774_v44  ;;  %v3888_v44 = vpack.c.bf16 %v5857_v58, %v5856_v15  ;;  %v1782_v15 = vand.u32 4294901760, %v1730_v62  ;;  %v1785_v58 = vand.u32 4294901760, %v1731_v52 }
 0x220   : > { %3374 = vmatprep.mubr.f32.mxu1 %v784_v19  ;;  %3867 = vmatpush3.bf16.msra.mxu1 %v3864_v34  ;;  %v5204_v19 = vld [vmem:[%s5788_s4 + $0x40] sm:$0xff]  ;;  %v1770_v34 = vand.u32 4294901760, %v5268_v27 }
 0x221   : > { %3869 = vmatprep.subr.bf16.mxu1 %v3868_v0  ;;  %v1764_v49 = vand.u32 4294901760, %v5204_v19 }
 0x223   : > { %3375 = vmatmul.mubr.f32.gmra.mrb[4].mxu1 %v794_v53  ;;  %v5209_v53 = vld [vmem:[%s5788_s4 + $0x48] sm:$0xff] }
 0x224   : > { %3377 = vmatprep.mubr.f32.mxu1 %v804_v54  ;;  %3871 = vmatpush3.bf16.msra.mxu1 %v3868_v0  ;;  %v1767_v6 = vand.u32 4294901760, %v5209_v53  ;;  %v5285_v0 = vpack.c.bf16 %v1773_v26, %v1770_v34 }
 0x225   : > { %3873 = vmatprep.subr.bf16.mxu1 %v3872_v35 }
 0x226   : > { %v5230_v18 = vpack.c.bf16 %v1767_v6, %v1764_v49 }
 0x227   : > { %3378 = vmatmul.mubr.f32.gmra.mrb[6].mxu1 %v814_v25 }
 0x228   : > { %3875 = vmatpush3.bf16.msra.mxu1 %v3872_v35  ;;  %3412 = vmatprep.mubr.f32.mxu1 %v4879_v11  ;;  %v5292_v35 = vld [vmem:[%s5788_s4 + $0x60] sm:$0xff] }
 0x229   : > { %3877 = vmatprep.subr.bf16.mxu1 %v3876_v46  ;;  %v1776_v2 = vand.u32 4294901760, %v5292_v35 }
 0x22c   : > { %3879 = vmatpush3.bf16.msra.mxu1 %v3876_v46  ;;  %v1779_v46 = vand.u32 4294901760, %v5297_v43 }
 0x22d   : > { %3881 = vmatprep.subr.bf16.mxu1 %v3880_v12 }
 0x22e   : > { %v5310_v36 = vpack.c.bf16 %v1779_v46, %v1776_v2 }
 0x230   : > { %3883 = vmatpush3.bf16.msra.mxu1 %v3880_v12 }
 0x231   : > { %3885 = vmatprep.subr.bf16.mxu1 %v3884_v50 }
 0x234   : > { %3887 = vmatpush3.bf16.msra.mxu1 %v3884_v50 }
 0x235   : > { %3889 = vmatprep.subr.bf16.mxu1 %v3888_v44 }
 0x238   : > { %3891 = vmatpush3.bf16.msra.mxu1 %v3888_v44 }
 0x239   : > { %3893 = vmatprep.subr.bf16.mxu1 %v4607_v10 }
 0x23b   : > { %3413 = vmatmul.mubr.f32.vlgmr.msra.gmra.mrb[0].mxu1 %v4895_v56 }
 0x23c   : > { %3415 = vmatprep.mubr.f32.mxu1 %v4923_v42  ;;  %3895 = vmatpush3.bf16.msra.mxu1 %v4607_v10  ;;  %v4351_v10 = vmov 64  }
 0x23d   : > { %3897 = vmatprep.subr.bf16.mxu1 %v4615_v13  ;;  %4268 = vset.pattern.permute.xlu1 %v4351_v10 }
 0x23e   : > { %4267 = vset.pattern.permute.xlu0 %v4351_v10 }
 0x23f   : > { %3416 = vmatmul.mubr.f32.gmra.mrb[2].mxu1 %v4938_v45 }
 0x240   : > { %3418 = vmatprep.mubr.f32.mxu1 %v4956_v41  ;;  %3899 = vmatpush3.bf16.msra.mxu1 %v4615_v13  ;;  %v5132_v13 = vld [vmem:[%s5788_s4] sm:$0xff] }
 0x241   : > { %3901 = vmatprep.subr.bf16.mxu1 %v4634_v16 }
 0x243   : > { %3419 = vmatmul.mubr.f32.gmra.mrb[4].mxu1 %v4964_v59 }
 0x244   : > { %3421 = vmatprep.mubr.f32.mxu1 %v4974_v20  ;;  %3903 = vmatpush3.bf16.msra.mxu1 %v4634_v16  ;;  %v5137_v16 = vld [vmem:[%s5788_s4 + $0x8] sm:$0xff] }
 0x245   : > { %3905 = vmatprep.subr.bf16.mxu1 %v4654_v21 }
 0x247   : > { %3422 = vmatmul.mubr.f32.gmra.mrb[6].mxu1 %v4982_v7 }
 0x248   : > { %3907 = vmatpush3.bf16.msra.mxu1 %v4654_v21  ;;  %3456 = vmatprep.mubr.f32.mxu1 %v4879_v11  ;;  %v5142_v21 = vld [vmem:[%s5788_s4 + $0x10] sm:$0xff] }
 0x249   : > { %3909 = vmatprep.subr.bf16.mxu1 %v4664_v24  ;;  %v5180_v11 = vld [vmem:[%s5788_s4 + $0x30] sm:$0xff] }
 0x24c   : > { %3911 = vmatpush3.bf16.msra.mxu1 %v4664_v24  ;;  %v1740_v24 = vand.u32 4294901760, %v5132_v13 }
 0x24d   : > { %3913 = vmatprep.subr.bf16.mxu1 %v4747_v57 }
 0x24e   : > { %v5315_v8 = vsub.f32 %v5132_v13, %v1740_v24 }
 0x250   : > { %3915 = vmatpush3.bf16.msra.mxu1 %v4747_v57  ;;  %v1743_v57 = vand.u32 4294901760, %v5137_v16  ;;  %v5818_v44 = vand.u32 4294901760, %v5315_v8 }
 0x251   : > { %3917 = vmatprep.subr.bf16.mxu1 %v4757_v28 }
 0x252   : > { %v5167_v47 = vpack.c.bf16 %v1743_v57, %v1740_v24  ;;  %v5320_v12 = vsub.f32 %v5137_v16, %v1743_v57  ;;  %v5334_v16 = vpack.c.bf16 %v1785_v58, %v1782_v15  ;;  %v1904_v24 = vsub.f32 %v5315_v8, %v5818_v44 }
 0x254   : > { %3919 = vmatpush3.bf16.msra.mxu1 %v4757_v28  ;;  %v5149_v28 = vld [vmem:[%s5788_s4 + $0x18] sm:$0xff]  ;;  %3925 = vmatprep.subr.bf16.mxu0 %v5167_v47  ;;  %v5817_v10 = vand.u32 4294901760, %v5320_v12 }
 0x255   : > { %3921 = vmatprep.subr.bf16.mxu1 %v4779_v1  ;;  %3927 = vmatpush3.bf16.msra.mxu0 %v5167_v47 }
 0x256   : > { %v1911_v57 = vsub.f32 %v5320_v12, %v5817_v10 }
 0x258   : > { %3923 = vmatpush3.bf16.msra.mxu1 %v4779_v1  ;;  %v1746_v1 = vand.u32 4294901760, %v5142_v21 }
 0x259   : > { %4116 = vmatprep.subr.bf16.mxu1 %v5167_v47 }
 0x25b   : > { %3457 = vmatmul.mubr.f32.vlgmr.msra.gmra.mrb[0].mxu1 %v4895_v56  ;;  %v5185_v56 = vld [vmem:[%s5788_s4 + $0x38] sm:$0xff] }
 0x25c   : > { %3459 = vmatprep.mubr.f32.mxu1 %v4923_v42  ;;  %v1749_v42 = vand.u32 4294901760, %v5149_v28  ;;  %4124 = vmatpush3.bf16.msra.mxu1 %v5167_v47 }
 0x25e   : > { %v5175_v61 = vpack.c.bf16 %v1749_v42, %v1746_v1 }
 0x25f   : > { %3460 = vmatmul.mubr.f32.gmra.mrb[2].mxu1 %v4938_v45  ;;  %v1758_v45 = vand.u32 4294901760, %v5180_v11 }
 0x260   : > { %3462 = vmatprep.mubr.f32.mxu1 %v4956_v41  ;;  %3929 = vmatprep.subr.bf16.mxu0 %v5175_v61  ;;  %v1761_v41 = vand.u32 4294901760, %v5185_v56 }
 0x261   : > { %4117 = vmatprep.subr.bf16.mxu1 %v5175_v61  ;;  %3931 = vmatpush3.bf16.msra.mxu0 %v5175_v61 }
 0x262   : > { %4125 = vmatpush3.bf16.msra.mxu1 %v5175_v61 }
 0x263   : > { %3463 = vmatmul.mubr.f32.gmra.mrb[4].mxu1 %v4964_v59  ;;  %v5196_v59 = vpack.c.bf16 %v1755_v60, %v1752_v48 }
 0x264   : > { %3465 = vmatprep.mubr.f32.mxu1 %v4974_v20  ;;  %v5218_v20 = vpack.c.bf16 %v1761_v41, %v1758_v45 }
 0x265   : > { %3933 = vmatprep.subr.bf16.mxu0 %v5196_v59  ;;  %4118 = vmatprep.subr.bf16.mxu1 %v5196_v59 }
 0x266   : > { %3935 = vmatpush3.bf16.msra.mxu0 %v5196_v59  ;;  %4126 = vmatpush3.bf16.msra.mxu1 %v5196_v59 }
 0x267   : > { %3466 = vmatmul.mubr.f32.gmra.mrb[6].mxu1 %v4982_v7  ;;  %3937 = vmatprep.subr.bf16.mxu0 %v5218_v20 }
 0x268   : > { %4119 = vmatprep.subr.bf16.mxu1 %v5218_v20 }
 0x26a   : > { %3939 = vmatpush3.bf16.msra.mxu0 %v5218_v20  ;;  %4127 = vmatpush3.bf16.msra.mxu1 %v5218_v20 }
 0x26b   : > { %3941 = vmatprep.subr.bf16.mxu0 %v5230_v18  ;;  %4120 = vmatprep.subr.bf16.mxu1 %v5230_v18 }
 0x26e   : > { %3943 = vmatpush3.bf16.msra.mxu0 %v5230_v18  ;;  %4128 = vmatpush3.bf16.msra.mxu1 %v5230_v18 }
 0x26f   : > { %3945 = vmatprep.subr.bf16.mxu0 %v5285_v0  ;;  %4121 = vmatprep.subr.bf16.mxu1 %v5285_v0 }
 0x272   : > { %3947 = vmatpush3.bf16.msra.mxu0 %v5285_v0  ;;  %4129 = vmatpush3.bf16.msra.mxu1 %v5285_v0 }
 0x273   : > { %3949 = vmatprep.subr.bf16.mxu0 %v5310_v36  ;;  %4122 = vmatprep.subr.bf16.mxu1 %v5310_v36 }
 0x276   : > { %3951 = vmatpush3.bf16.msra.mxu0 %v5310_v36  ;;  %4130 = vmatpush3.bf16.msra.mxu1 %v5310_v36 }
 0x277   : > { %3953 = vmatprep.subr.bf16.mxu0 %v5334_v16  ;;  %4123 = vmatprep.subr.bf16.mxu1 %v5334_v16 }
 0x27a   : > { %3955 = vmatpush3.bf16.msra.mxu0 %v5334_v16  ;;  %4131 = vmatpush3.bf16.msra.mxu1 %v5334_v16 }
 0x32e   : > { %v5240_v63 = vpop.f32.mrb[0].mxu1 }
 0x32f   : > { %v1604_v7 = vmax.f32 %v5240_v63, 1.0  ;;  %v5243_v37 = vpop.f32.mrb[1].mxu1 }
 0x330   : > { %v1603_v23 = vmax.f32 %v5243_v37, 1.0 }
 0x331   : > { %4269 = vrcp.f32 %v1604_v7 }
 0x332   : > { %4271 = vrcp.f32 %v1603_v23  ;;  %v5246_v54 = vpop.f32.mrb[2].mxu1  ;;  %v1905_v23 = vand.u32 4294901760, %v1904_v24  ;;  %v5368_v24 = vsub.f32 %v5273_v32, %v1773_v26  ;;  %v5383_v32 = vsub.f32 %v5292_v35, %v1776_v2 }
 0x333   : > { %v5248_v9 = vpop.f32.mrb[3].mxu1  ;;  %v1606_v5 = vmax.f32 %v5246_v54, 1.0  ;;  %v5399_v35 = vsub.f32 %v1731_v52, %v1785_v58 }
 0x334   : > { %v1605_v25 = vmax.f32 %v5248_v9, 1.0 }
 0x335   : > { %5858 = vst [vmem:[#allocation5_spill] sm:$0xff] %v5399_v35 }
 0x336   : > { %v5252_v22 = vpop.f32.mrb[4].mxu1  ;;  %4273 = vrcp.f32 %v1605_v25  ;;  %v1912_v25 = vand.u32 4294901760, %v1911_v57 }
 0x337   : > { %v5254_v38 = vpop.f32.mrb[5].mxu1  ;;  %4275 = vrcp.f32 %v1606_v5  ;;  %v1608_v55 = vmax.f32 %v5252_v22, 1.0 }
 0x338   : > { %v1607_v14 = vmax.f32 %v5254_v38, 1.0 }
 0x33a   : > { %v5258_v51 = vpop.f32.mrb[6].mxu1  ;;  %4277 = vrcp.f32 %v1607_v14  ;;  %v5346_v14 = vpack.c.bf16 %v1912_v25, %v1905_v23 }
 0x33b   : > { %v4270_v31 = vpop.eup %4269  ;;  %v5275_v33 = vpop.f32.mrb[7].mxu1  ;;  %4279 = vrcp.f32 %v1608_v55  ;;  %v1610_v3 = vmax.f32 %v5258_v51, 1.0 }
 0x33c   : > { %v4272_v17 = vpop.eup %4271  ;;  %1626 = vperm.xlu1 %4268, %v4270_v31   ;;  %v1609_v29 = vmax.f32 %v5275_v33, 1.0  ;;  %3957 = vmatprep.subr.bf16.mxu0 %v5346_v14 }
 0x33d   : > { %1621 = vperm.xlu0 %4267, %v4272_v17   ;;  %v1669_v17 = vld [vmem:[%s5263_s12 + $0x10] sm:$0xff] }
 0x33e   : > { %4281 = vrcp.f32 %v1609_v29  ;;  %v1670_v29 = vld [vmem:[%s5263_s12 + $0x18] sm:$0xff] }
 0x33f   : > { %4283 = vrcp.f32 %v1610_v3  ;;  %v1672_v3 = vld [vmem:[%s5263_s12 + $0x28] sm:$0xff] }
 0x340   : > { %1683 = vrot.lane.b32.xlu1 %v1667_v30, %s4352_s26  ;;  %v4274_v50 = vpop.eup %4273  ;;  %v1671_v30 = vld [vmem:[%s5263_s12 + $0x20] sm:$0xff] }
 0x341   : > { %1685 = vrot.lane.b32.xlu0 %v1668_v4, %s4352_s26  ;;  %v4276_v13 = vpop.eup %4275  ;;  %v1673_v4 = vld [vmem:[%s5263_s12 + $0x30] sm:$0xff] }
 0x344   : > { %1631 = vperm.xlu1 %4268, %v4274_v50   ;;  %v4278_v7 = vpop.eup %4277  ;;  %v1674_v50 = vld [vmem:[%s5263_s12 + $0x38] sm:$0xff] }
 0x345   : > { %1636 = vperm.xlu0 %4267, %v4276_v13   ;;  %v4280_v5 = vpop.eup %4279  ;;  %v5363_v13 = vsub.f32 %v5268_v27, %v1770_v34  ;;  %v5388_v34 = vsub.f32 %v5297_v43, %v1779_v46 }
 0x347   : > { %v5812_v57 = vand.u32 4294901760, %v5363_v13 }
 0x348   : > { %1641 = vperm.xlu1 %4268, %v4278_v7   ;;  %v4282_v55 = vpop.eup %4281  ;;  %v5811_v7 = vand.u32 4294901760, %v5368_v24 }
 0x349   : > { %1646 = vperm.xlu0 %4267, %v4280_v5   ;;  %v4284_v31 = vpop.eup %4283  ;;  %v1974_v23 = vsub.f32 %v5363_v13, %v5812_v57  ;;  %v5810_v5 = vand.u32 4294901760, %v5383_v32 }
 0x34a   : > { %v1981_v27 = vsub.f32 %v5368_v24, %v5811_v7 }
 0x34b   : > { %v1975_v26 = vand.u32 4294901760, %v1974_v23  ;;  %v5418_v23 = vpack.c.bf16 %v5320_v12, %v5315_v8 }
 0x34c   : > { %1651 = vperm.xlu1 %4268, %v4282_v55   ;;  %v1982_v25 = vand.u32 4294901760, %v1981_v27  ;;  %v5809_v55 = vand.u32 4294901760, %v5388_v34  ;;  %v5422_v27 = vpack.c.bf16 %v5368_v24, %v5363_v13 }
 0x34d   : > { %1656 = vperm.xlu0 %4267, %v4284_v31  }
 0x34e   : > { %v5392_v31 = vpack.c.bf16 %v1982_v25, %v1975_v26  ;;  %v1995_v43 = vsub.f32 %v5388_v34, %v5809_v55  ;;  %v5426_v26 = vpack.c.bf16 %v5388_v34, %v5383_v32 }
 0x350   : > { %1687 = vrot.lane.b32.xlu1 %v1669_v17, %s4352_s26  ;;  %v1988_v17 = vsub.f32 %v5383_v32, %v5810_v5 }
 0x351   : > { %1689 = vrot.lane.b32.xlu0 %v1670_v29, %s4352_s26  ;;  %v5397_v29 = vsub.f32 %v1730_v62, %v1782_v15 }
 0x352   : > { %v1989_v2 = vand.u32 4294901760, %v1988_v17  ;;  %v5435_v17 = vsub.f32 %v5142_v21, %v1746_v1  ;;  %v5453_v21 = vsub.f32 %v5160_v40, %v1755_v60  ;;  %v5470_v60 = vsub.f32 %v5180_v11, %v1758_v45 }
 0x353   : > { %v5808_v46 = vand.u32 4294901760, %v5397_v29  ;;  %v5430_v25 = vpack.c.bf16 %v5399_v35, %v5397_v29 }
 0x354   : > { %1691 = vrot.lane.b32.xlu1 %v1671_v30, %s4352_s26  ;;  %v5807_v30 = vand.u32 4294901760, %v5399_v35 }
 0x355   : > { %1693 = vrot.lane.b32.xlu0 %v1672_v3, %s4352_s26  ;;  %v1996_v3 = vand.u32 4294901760, %v1995_v43  ;;  %v5440_v43 = vsub.f32 %v5149_v28, %v1749_v42 }
 0x356   : > { %v2009_v62 = vsub.f32 %v5399_v35, %v5807_v30 }
 0x357   : > { %v5412_v52 = vpack.c.bf16 %v1996_v3, %v1989_v2 }
 0x358   : > { %1695 = vrot.lane.b32.xlu1 %v1673_v4, %s4352_s26  ;;  %v2002_v4 = vsub.f32 %v5397_v29, %v5808_v46  ;;  %v2010_v58 = vand.u32 4294901760, %v2009_v62  ;;  %v5815_v62 = vand.u32 4294901760, %v5440_v43 }
 0x359   : > { %1697 = vrot.lane.b32.xlu0 %v1674_v50, %s4352_s26  ;;  %s4285_s26 = scalar_lea.vmem %s5739_s17, 1024 }
 0x35a   : > { %v2003_v15 = vand.u32 4294901760, %v2002_v4  ;;  %v5816_v4 = vand.u32 4294901760, %v5435_v17  ;;  %p4286_p11 = scmp.ne.s32.totalorder %s5739_s17, %s4285_s26  ;;  %p4293_p1 = scmp.lt.s32.totalorder %s4291_s9, %s4285_s26 }
 0x35c   : > { %v5414_v50 = vpack.c.bf16 %v2010_v58, %v2003_v15  ;;  %v5447_v15 = vsub.f32 %v5155_v39, %v1752_v48  ;;  %v1918_v46 = vsub.f32 %v5435_v17, %v5816_v4  ;;  %v1925_v39 = vsub.f32 %v5440_v43, %v5815_v62  ;;  %p4287_p12 = pnand %p4286_p11, %p4429_p5  ;;  %p4294_p2 = por %p4293_p1, %p4292_p0 }
 0x35e   : > { %v5813_v48 = vand.u32 4294901760, %v5447_v15  ;;  %v1919_v55 = vand.u32 4294901760, %v1918_v46  ;;  %v1926_v11 = vand.u32 4294901760, %v1925_v39  ;;  %v5499_v46 = vsub.f32 %v5204_v19, %v1764_v49  ;;  %p4288_p13 = pneg %p4287_p12 }
 0x35f   : > { %v5504_v39 = vsub.f32 %v5209_v53, %v1767_v6 }
 0x360   : > { %v3960_v62 = vpack.c.bf16 %v1926_v11, %v1919_v55  ;;  %v5823_v44 = vand.u32 4294901760, %v5499_v46  ;;  %p4295_p3 = pnand %p4294_p2, %p4288_p13 }
 0x3bb   : > { %v1627_v2 = vpop.permute.xlu1 %1626 }
 0x3bc   : > { %v1622_v3 = vpop.permute.xlu0 %1621  ;;  %v1660_v28 = vmul.f32 %v5240_v63, %v1627_v2  ;;  %v5475_v63 = vsub.f32 %v5185_v56, %v1761_v41  ;;  %v1932_v56 = vsub.f32 %v5447_v15, %v5813_v48  ;;  %v1945_v41 = vand.u32 4294901760, %v5470_v60 }
 0x3bd   : > { %v1659_v58 = vmul.f32 %v1622_v3, %v5243_v37  ;;  %v5814_v3 = vand.u32 4294901760, %v5453_v21 }
 0x3be   : > { %v5822_v5 = vand.u32 4294901760, %v5475_v63  ;;  %v1933_v10 = vand.u32 4294901760, %v1932_v56  ;;  %v1946_v19 = vsub.f32 %v5470_v60, %v1945_v41 }
 0x3bf   : > { %v1684_v1 = vpop.permute.xlu1 %1683 }
 0x3c0   : > { %v1708_v42 = vsel %vm1707_vm10, %v1659_v58, %v1684_v1  ;;  %v1686_v30 = vpop.permute.xlu0 %1685  ;;  %v1953_v53 = vsub.f32 %v5475_v63, %v5822_v5 }
 0x3c1   : > { %v5464_v37 = vand.u32 4294901760, %v1708_v42  ;;  %v1709_v40 = vsel %vm1707_vm10, %v1660_v28, %v1686_v30 }
 0x3c2   : > { %v5477_v2 = vand.u32 4294901760, %v1709_v40  ;;  %v1954_v55 = vand.u32 4294901760, %v1953_v53 }
 0x3c3   : > { %v5481_v58 = vsub.f32 %v1708_v42, %v5464_v37  ;;  %v1632_v1 = vpop.permute.xlu1 %1631 }
 0x3c4   : > { %v5484_v30 = vsub.f32 %v1709_v40, %v5477_v2  ;;  %v1637_v28 = vpop.permute.xlu0 %1636  ;;  %v1939_v40 = vsub.f32 %v5453_v21, %v5814_v3  ;;  %v1661_v11 = vmul.f32 %v1632_v1, %v5248_v9 }
 0x3c5   : > { %v5819_v45 = vand.u32 4294901760, %v5481_v58 }
 0x3c6   : > { %v5820_v42 = vand.u32 4294901760, %v5484_v30  ;;  %v1940_v6 = vand.u32 4294901760, %v1939_v40 }
 0x3c7   : > { %v1642_v7 = vpop.permute.xlu1 %1641  ;;  %v1823_v57 = vsub.f32 %v5481_v58, %v5819_v45  ;;  %v5824_v45 = vand.u32 4294901760, %v5504_v39 }
 0x3c8   : > { %v1833_v48 = vsub.f32 %v5484_v30, %v5820_v42  ;;  %v1647_v3 = vpop.permute.xlu0 %1646  ;;  %v3964_v56 = vpack.c.bf16 %v1940_v6, %v1933_v10  ;;  %v1663_v1 = vmul.f32 %v1642_v7, %v5254_v38 }
 0x3c9   : > { %v1824_v4 = vand.u32 4294901760, %v1823_v57  ;;  %v1947_v57 = vand.u32 4294901760, %v1946_v19  ;;  %v1967_v40 = vsub.f32 %v5504_v39, %v5824_v45  ;;  %v1664_v45 = vmul.f32 %v5252_v22, %v1647_v3 }
 0x3ca   : > { %v1834_v49 = vand.u32 4294901760, %v1833_v48  ;;  %v1960_v48 = vsub.f32 %v5499_v46, %v5823_v44 }
 0x3cb   : > { %3500 = vmatprep.mubr.f32.mxu0 %v1824_v4  ;;  %v1652_v42 = vpop.permute.xlu1 %1651  ;;  %v1662_v4 = vmul.f32 %v5246_v54, %v1637_v28  ;;  %v3968_v10 = vpack.c.bf16 %v1954_v55, %v1947_v57  ;;  %v1968_v44 = vand.u32 4294901760, %v1967_v40 }
 0x3cc   : > { %v1657_v35 = vpop.permute.xlu0 %1656  ;;  %3501 = vmatmul.mubr.f32.vlgmr.msra.gmra.mrb[16].mxu0 %v1834_v49  ;;  %v1961_v6 = vand.u32 4294901760, %v1960_v48  ;;  %v1665_v55 = vmul.f32 %v1652_v42, %v5275_v33 }
 0x3cd   : > { %3959 = vmatpush3.bf16.msra.mxu0 %v5346_v14  ;;  %v1666_v40 = vmul.f32 %v5258_v51, %v1657_v35 }
 0x3ce   : > { %3961 = vmatprep.subr.bf16.mxu0 %v3960_v62  ;;  %v3972_v3 = vpack.c.bf16 %v1968_v44, %v1961_v6 }
 0x3cf   : > { %v1688_v5 = vpop.permute.xlu1 %1687 }
 0x3d0   : > { %v1710_v49 = vsel %vm1707_vm10, %v1661_v11, %v1688_v5  ;;  %v1690_v14 = vpop.permute.xlu0 %1689 }
 0x3d1   : > { %v5530_v19 = vand.u32 4294901760, %v1710_v49  ;;  %v1711_v9 = vsel %vm1707_vm10, %v1662_v4, %v1690_v14  ;;  %3963 = vmatpush3.bf16.msra.mxu0 %v3960_v62 }
 0x3d2   : > { %v5534_v53 = vand.u32 4294901760, %v1711_v9  ;;  %3965 = vmatprep.subr.bf16.mxu0 %v3964_v56 }
 0x3d3   : > { %v5538_v54 = vsub.f32 %v1710_v49, %v5530_v19  ;;  %v1692_v5 = vpop.permute.xlu1 %1691 }
 0x3d4   : > { %v5541_v28 = vsub.f32 %v1711_v9, %v5534_v53  ;;  %v1712_v11 = vsel %vm1707_vm10, %v1663_v1, %v1692_v5  ;;  %v1694_v62 = vpop.permute.xlu0 %1693 }
 0x3d5   : > { %v5544_v57 = vand.u32 4294901760, %v1712_v11  ;;  %v1713_v38 = vsel %vm1707_vm10, %v1664_v45, %v1694_v62  ;;  %3967 = vmatpush3.bf16.msra.mxu0 %v3964_v56  ;;  %v1842_v7 = vand.u32 4294901760, %v5538_v54 }
 0x3d6   : > { %v5549_v22 = vand.u32 4294901760, %v1713_v38  ;;  %3969 = vmatprep.subr.bf16.mxu0 %v3968_v10  ;;  %v1852_v48 = vand.u32 4294901760, %v5541_v28 }
 0x3d7   : > { %v5554_v4 = vsub.f32 %v1712_v11, %v5544_v57  ;;  %3726 = vmatprep.mubr.f32.mxu1 %v5544_v57  ;;  %v1696_v49 = vpop.permute.xlu1 %1695  ;;  %v1843_v45 = vsub.f32 %v5538_v54, %v1842_v7 }
 0x3d8   : > { %v5561_v33 = vsub.f32 %v1713_v38, %v5549_v22  ;;  %v1714_v42 = vsel %vm1707_vm10, %v1665_v55, %v1696_v49  ;;  %v1698_v44 = vpop.permute.xlu0 %1697  ;;  %3727 = vmatmul.mubr.f32.vlgmr.msra.gmra.mrb[8].mxu1 %v5549_v22  ;;  %v1853_v51 = vsub.f32 %v5541_v28, %v1852_v48 }
 0x3d9   : > { %v5568_v35 = vand.u32 4294901760, %v1714_v42  ;;  %v1715_v56 = vsel %vm1707_vm10, %v1666_v40, %v1698_v44  ;;  %3971 = vmatpush3.bf16.msra.mxu0 %v3968_v10  ;;  %v1844_v14 = vand.u32 4294901760, %v1843_v45  ;;  %v1862_v9 = vand.u32 4294901760, %v5554_v4 }
 0x3da   : > { %v5572_v1 = vand.u32 4294901760, %v1715_v56  ;;  %3973 = vmatprep.subr.bf16.mxu0 %v3972_v3  ;;  %v1854_v6 = vand.u32 4294901760, %v1853_v51  ;;  %v1872_v5 = vand.u32 4294901760, %v5561_v33 }
 0x3db   : > { %v5576_v11 = vsub.f32 %v1714_v42, %v5568_v35  ;;  %3503 = vmatprep.mubr.f32.mxu0 %v1844_v14  ;;  %3729 = vmatprep.mubr.f32.mxu1 %v5568_v35  ;;  %v1863_v62 = vsub.f32 %v5554_v4, %v1862_v9  ;;  %v5863_v14 = vand.u32 4294901760, %v5440_v43 }
 0x3dc   : > { %v5583_v10 = vsub.f32 %v1715_v56, %v5572_v1  ;;  %3504 = vmatmul.mubr.f32.gmra.mrb[18].mxu0 %v1854_v6  ;;  %3730 = vmatmul.mubr.f32.gmra.mrb[10].mxu1 %v5572_v1  ;;  %v1873_v38 = vsub.f32 %v5561_v33, %v1872_v5  ;;  %v3992_v56 = vpack.c.bf16 %v5440_v43, %v5435_v17 }
 0x3dd   : > { %3975 = vmatpush3.bf16.msra.mxu0 %v3972_v3  ;;  %v1864_v55 = vand.u32 4294901760, %v1863_v62  ;;  %v1882_v40 = vand.u32 4294901760, %v5576_v11  ;;  %v5864_v62 = vand.u32 4294901760, %v5484_v30 }
 0x3de   : > { %3977 = vmatprep.subr.bf16.mxu0 %v5392_v31  ;;  %v1874_v49 = vand.u32 4294901760, %v1873_v38  ;;  %v1892_v45 = vand.u32 4294901760, %v5583_v10 }
 0x3df   : > { %3506 = vmatprep.mubr.f32.mxu0 %v1864_v55  ;;  %v1883_v42 = vsub.f32 %v5576_v11, %v1882_v40 }
 0x3e0   : > { %3507 = vmatmul.mubr.f32.gmra.mrb[20].mxu0 %v1874_v49  ;;  %v1893_v44 = vsub.f32 %v5583_v10, %v1892_v45 }
 0x3e1   : > { %3979 = vmatpush3.bf16.msra.mxu0 %v5392_v31  ;;  %v1884_v3 = vand.u32 4294901760, %v1883_v42  ;;  %v3996_v31 = vpack.c.bf16 %v5453_v21, %v5447_v15 }
 0x3e2   : > { %3981 = vmatprep.subr.bf16.mxu0 %v5412_v52  ;;  %v1894_v51 = vand.u32 4294901760, %v1893_v44 }
 0x3e3   : > { %3509 = vmatprep.mubr.f32.mxu0 %v1884_v3 }
 0x3e4   : > { %3510 = vmatmul.mubr.f32.gmra.mrb[22].mxu0 %v1894_v51 }
 0x3e5   : > { %3983 = vmatpush3.bf16.msra.mxu0 %v5412_v52  ;;  %3544 = vmatprep.mubr.f32.mxu0 %v5464_v37  ;;  %v4000_v52 = vpack.c.bf16 %v5475_v63, %v5470_v60  ;;  %v5870_v60 = vand.u32 4294901760, %v5363_v13 }
 0x3e6   : > { %3985 = vmatprep.subr.bf16.mxu0 %v5414_v50 }
 0x3e9   : > { %3987 = vmatpush3.bf16.msra.mxu0 %v5414_v50  ;;  %v4004_v50 = vpack.c.bf16 %v5504_v39, %v5499_v46 }
 0x3ea   : > { %3989 = vmatprep.subr.bf16.mxu0 %v5418_v23 }
 0x3ec   : > { %3545 = vmatmul.mubr.f32.vlgmr.msra.gmra.mrb[16].mxu0 %v5477_v2 }
 0x3ed   : > { %3547 = vmatprep.mubr.f32.mxu0 %v5530_v19  ;;  %3991 = vmatpush3.bf16.msra.mxu0 %v5418_v23  ;;  %v5859_v23 = vand.u32 4294901760, %v5481_v58 }
 0x3ee   : > { %3993 = vmatprep.subr.bf16.mxu0 %v3992_v56 }
 0x3f0   : > { %3548 = vmatmul.mubr.f32.gmra.mrb[18].mxu0 %v5534_v53 }
 0x3f1   : > { %3550 = vmatprep.mubr.f32.mxu0 %v5544_v57  ;;  %3995 = vmatpush3.bf16.msra.mxu0 %v3992_v56 }
 0x3f2   : > { %3997 = vmatprep.subr.bf16.mxu0 %v3996_v31 }
 0x3f4   : > { %3551 = vmatmul.mubr.f32.gmra.mrb[20].mxu0 %v5549_v22 }
 0x3f5   : > { %3553 = vmatprep.mubr.f32.mxu0 %v5568_v35  ;;  %3999 = vmatpush3.bf16.msra.mxu0 %v3996_v31 }
 0x3f6   : > { %4001 = vmatprep.subr.bf16.mxu0 %v4000_v52 }
 0x3f8   : > { %3554 = vmatmul.mubr.f32.gmra.mrb[22].mxu0 %v5572_v1 }
 0x3f9   : > { %4003 = vmatpush3.bf16.msra.mxu0 %v4000_v52  ;;  %3588 = vmatprep.mubr.f32.mxu0 %v5481_v58  ;;  %v5862_v58 = vand.u32 4294901760, %v5435_v17  ;;  %v5867_v17 = vand.u32 4294901760, %v5475_v63  ;;  %v5871_v63 = vand.u32 4294901760, %v5368_v24 }
 0x3fa   : > { %4005 = vmatprep.subr.bf16.mxu0 %v4004_v50 }
 0x3fb   : > { %v4056_v6 = vpack.c.bf16 %v5863_v14, %v5862_v58  ;;  %v4064_v43 = vpack.c.bf16 %v5867_v17, %v1945_v41  ;;  %v4072_v41 = vpack.c.bf16 %v5871_v63, %v5870_v60 }
 0x3fd   : > { %4007 = vmatpush3.bf16.msra.mxu0 %v4004_v50 }
 0x3fe   : > { %4009 = vmatprep.subr.bf16.mxu0 %v5422_v27 }
 0x401   : > { %4011 = vmatpush3.bf16.msra.mxu0 %v5422_v27  ;;  %v5860_v27 = vand.u32 4294901760, %v5315_v8  ;;  %v5865_v8 = vand.u32 4294901760, %v5447_v15  ;;  %v5868_v15 = vand.u32 4294901760, %v5499_v46  ;;  %v5873_v46 = vand.u32 4294901760, %v5388_v34 }
 0x402   : > { %4013 = vmatprep.subr.bf16.mxu0 %v5426_v26 }
 0x405   : > { %4015 = vmatpush3.bf16.msra.mxu0 %v5426_v26  ;;  %v5861_v26 = vand.u32 4294901760, %v5320_v12  ;;  %v5866_v12 = vand.u32 4294901760, %v5453_v21  ;;  %v5869_v21 = vand.u32 4294901760, %v5504_v39 }
 0x406   : > { %4017 = vmatprep.subr.bf16.mxu0 %v5430_v25 }
 0x407   : > { %v4060_v38 = vpack.c.bf16 %v5866_v12, %v5865_v8 }
 0x409   : > { %4019 = vmatpush3.bf16.msra.mxu0 %v5430_v25  ;;  %v4052_v25 = vpack.c.bf16 %v5861_v26, %v5860_v27 }
 0x40a   : > { %4021 = vmatprep.subr.bf16.mxu0 %v5167_v47 }
 0x40c   : > { %3589 = vmatmul.mubr.f32.vlgmr.msra.gmra.mrb[16].mxu0 %v5484_v30  ;;  %v4068_v30 = vpack.c.bf16 %v5869_v21, %v5868_v15 }
 0x40d   : > { %3591 = vmatprep.mubr.f32.mxu0 %v5538_v54  ;;  %4023 = vmatpush3.bf16.msra.mxu0 %v5167_v47  ;;  %v5872_v54 = vand.u32 4294901760, %v5383_v32 }
 0x40e   : > { %4025 = vmatprep.subr.bf16.mxu0 %v5175_v61 }
 0x40f   : > { %v4076_v39 = vpack.c.bf16 %v5873_v46, %v5872_v54 }
 0x410   : > { %3592 = vmatmul.mubr.f32.gmra.mrb[18].mxu0 %v5541_v28  ;;  %v5874_v28 = vand.u32 4294901760, %v5397_v29 }
 0x411   : > { %3594 = vmatprep.mubr.f32.mxu0 %v5554_v4  ;;  %4027 = vmatpush3.bf16.msra.mxu0 %v5175_v61 }
 0x412   : > { %4029 = vmatprep.subr.bf16.mxu0 %v5196_v59 }
 0x414   : > { %3595 = vmatmul.mubr.f32.gmra.mrb[20].mxu0 %v5561_v33 }
 0x415   : > { %3597 = vmatprep.mubr.f32.mxu0 %v5576_v11  ;;  %4031 = vmatpush3.bf16.msra.mxu0 %v5196_v59 }
 0x416   : > { %4033 = vmatprep.subr.bf16.mxu0 %v5218_v20 }
 0x418   : > { %3598 = vmatmul.mubr.f32.gmra.mrb[22].mxu0 %v5583_v10 }
 0x419   : > { %4035 = vmatpush3.bf16.msra.mxu0 %v5218_v20  ;;  %3632 = vmatprep.mubr.f32.mxu0 %v5859_v23 }
 0x41a   : > { %4037 = vmatprep.subr.bf16.mxu0 %v5230_v18 }
 0x41d   : > { %4039 = vmatpush3.bf16.msra.mxu0 %v5230_v18 }
 0x41e   : > { %4041 = vmatprep.subr.bf16.mxu0 %v5285_v0 }
 0x421   : > { %4043 = vmatpush3.bf16.msra.mxu0 %v5285_v0 }
 0x422   : > { %4045 = vmatprep.subr.bf16.mxu0 %v5310_v36 }
 0x425   : > { %4047 = vmatpush3.bf16.msra.mxu0 %v5310_v36 }
 0x426   : > { %4049 = vmatprep.subr.bf16.mxu0 %v5334_v16 }
 0x429   : > { %4051 = vmatpush3.bf16.msra.mxu0 %v5334_v16 }
 0x42a   : > { %4053 = vmatprep.subr.bf16.mxu0 %v4052_v25 }
 0x42c   : > { %3633 = vmatmul.mubr.f32.vlgmr.msra.gmra.mrb[16].mxu0 %v5864_v62 }
 0x42d   : > { %3635 = vmatprep.mubr.f32.mxu0 %v1842_v7  ;;  %4055 = vmatpush3.bf16.msra.mxu0 %v4052_v25  ;;  %v5875_v7 = vld [vmem:[#allocation5_spill] sm:$0xff] }
 0x42e   : > { %4057 = vmatprep.subr.bf16.mxu0 %v4056_v6 }
 0x430   : > { %3636 = vmatmul.mubr.f32.gmra.mrb[18].mxu0 %v1852_v48  ;;  %v5876_v48 = vand.u32 4294901760, %v5875_v7 }
 0x431   : > { %3638 = vmatprep.mubr.f32.mxu0 %v1862_v9  ;;  %4059 = vmatpush3.bf16.msra.mxu0 %v4056_v6 }
 0x432   : > { %4061 = vmatprep.subr.bf16.mxu0 %v4060_v38  ;;  %v4080_v4 = vpack.c.bf16 %v5876_v48, %v5874_v28 }
 0x434   : > { %3639 = vmatmul.mubr.f32.gmra.mrb[20].mxu0 %v1872_v5 }
 0x435   : > { %3641 = vmatprep.mubr.f32.mxu0 %v1882_v40  ;;  %4063 = vmatpush3.bf16.msra.mxu0 %v4060_v38 }
 0x436   : > { %4065 = vmatprep.subr.bf16.mxu0 %v4064_v43 }
 0x438   : > { %3642 = vmatmul.mubr.f32.gmra.mrb[22].mxu0 %v1892_v45 }
 0x439   : > { %4067 = vmatpush3.bf16.msra.mxu0 %v4064_v43  ;;  %3676 = vmatprep.mubr.f32.mxu0 %v5464_v37 }
 0x43a   : > { %4069 = vmatprep.subr.bf16.mxu0 %v4068_v30 }
 0x43d   : > { %4071 = vmatpush3.bf16.msra.mxu0 %v4068_v30 }
 0x43e   : > { %4073 = vmatprep.subr.bf16.mxu0 %v4072_v41 }
 0x441   : > { %4075 = vmatpush3.bf16.msra.mxu0 %v4072_v41 }
 0x442   : > { %4077 = vmatprep.subr.bf16.mxu0 %v4076_v39 }
 0x445   : > { %4079 = vmatpush3.bf16.msra.mxu0 %v4076_v39 }
 0x446   : > { %4081 = vmatprep.subr.bf16.mxu0 %v4080_v4 }
 0x449   : > { %4083 = vmatpush3.bf16.msra.mxu0 %v4080_v4 }
 0x44a   : > { %4085 = vmatprep.subr.bf16.mxu0 %v5167_v47 }
 0x44c   : > { %3677 = vmatmul.mubr.f32.vlgmr.msra.gmra.mrb[16].mxu0 %v5477_v2 }
 0x44d   : > { %3679 = vmatprep.mubr.f32.mxu0 %v5530_v19  ;;  %4087 = vmatpush3.bf16.msra.mxu0 %v5167_v47 }
 0x44e   : > { %4089 = vmatprep.subr.bf16.mxu0 %v5175_v61 }
 0x450   : > { %3680 = vmatmul.mubr.f32.gmra.mrb[18].mxu0 %v5534_v53 }
 0x451   : > { %3682 = vmatprep.mubr.f32.mxu0 %v5544_v57  ;;  %4091 = vmatpush3.bf16.msra.mxu0 %v5175_v61 }
 0x452   : > { %4093 = vmatprep.subr.bf16.mxu0 %v5196_v59 }
 0x454   : > { %3683 = vmatmul.mubr.f32.gmra.mrb[20].mxu0 %v5549_v22 }
 0x455   : > { %3685 = vmatprep.mubr.f32.mxu0 %v5568_v35  ;;  %4095 = vmatpush3.bf16.msra.mxu0 %v5196_v59 }
 0x456   : > { %4097 = vmatprep.subr.bf16.mxu0 %v5218_v20 }
 0x458   : > { %3686 = vmatmul.mubr.f32.gmra.mrb[22].mxu0 %v5572_v1 }
 0x459   : > { %4099 = vmatpush3.bf16.msra.mxu0 %v5218_v20  ;;  %3720 = vmatprep.mubr.f32.mxu0 %v5464_v37 }
 0x45a   : > { %4101 = vmatprep.subr.bf16.mxu0 %v5230_v18 }
 0x45d   : > { %4103 = vmatpush3.bf16.msra.mxu0 %v5230_v18  ;;  %v2869_v18 = vld [vmem:[%s5789_s5] ss:$0 sm:$0xff] }
 0x45e   : > { %4105 = vmatprep.subr.bf16.mxu0 %v5285_v0 }
 0x461   : > { %4107 = vmatpush3.bf16.msra.mxu0 %v5285_v0 }
 0x462   : > { %4109 = vmatprep.subr.bf16.mxu0 %v5310_v36 }
 0x465   : > { %4111 = vmatpush3.bf16.msra.mxu0 %v5310_v36 }
 0x466   : > { %4113 = vmatprep.subr.bf16.mxu0 %v5334_v16 }
 0x469   : > { %4115 = vmatpush3.bf16.msra.mxu0 %v5334_v16 }
 0x46c   : > { %3721 = vmatmul.mubr.f32.vlgmr.msra.gmra.mrb[16].mxu0 %v5477_v2 }
 0x46d   : > { %3723 = vmatprep.mubr.f32.mxu0 %v5530_v19 }
 0x470   : > { %3724 = vmatmul.mubr.f32.gmra.mrb[18].mxu0 %v5534_v53 }
 0x4ab   : > { %v3728_v47 = vpop.f32.mrb[8].mxu1 }
 0x4ac   : > { %v2659_v61 = vpop.f32.mrb[9].mxu1 }
 0x4af   : > { %v3731_v59 = vpop.f32.mrb[10].mxu1 }
 0x4b0   : > { %v2671_v20 = vpop.f32.mrb[11].mxu1 }
 0x527   : > { %v3684_v0 = vpop.f32.mrb[20].mxu0 }
 0x528   : > { %v4136_v36 = vadd.f32 %v3684_v0, %v2869_v18  ;;  %v2530_v16 = vpop.f32.mrb[21].mxu0 }
 0x529   : > { %v4138_v13 = vadd.f32 %v2869_v18, %v2530_v16 }
 0x52a   : > { %v4137_v24 = vadd.f32 %v4136_v36, %v3728_v47 }
 0x52b   : > { %v4139_v32 = vadd.f32 %v4138_v13, %v2659_v61  ;;  %v3687_v34 = vpop.f32.mrb[22].mxu0 }
 0x52c   : > { %2686 = vst [vmem:[%s245_s15 + $0x28] sm:$0xff] %v4137_v24  ;;  %v4140_v29 = vadd.f32 %v3687_v34, %v2869_v18  ;;  %v2542_v37 = vpop.f32.mrb[23].mxu0 }
 0x52d   : > { %2685 = vst [vmem:[%s245_s15 + $0x20] sm:$0xff] %v4139_v32  ;;  %v4142_v2 = vadd.f32 %v2869_v18, %v2542_v37 }
 0x52e   : > { %v4141_v19 = vadd.f32 %v4140_v29, %v3731_v59 }
 0x52f   : > { %v4143_v53 = vadd.f32 %v4142_v2, %v2671_v20 }
 0x530   : > { %2688 = vst [vmem:[%s245_s15 + $0x38] sm:$0xff] %v4141_v19 }
 0x531   : > { %2687 = vst [vmem:[%s245_s15 + $0x30] sm:$0xff] %v4143_v53 }
 0x53f   : > { %v3722_v57 = vpop.f32.mrb[16].mxu0 }
 0x540   : > { %v4132_v22 = vadd.f32 %v3722_v57, %v2869_v18  ;;  %v2635_v33 = vpop.f32.mrb[17].mxu0 }
 0x541   : > { %v4133_v35 = vadd.f32 %v2869_v18, %v2635_v33 }
 0x542   : > { %2682 = vst [vmem:[%s245_s15 + $0x8] sm:$0xff] %v4132_v22 }
 0x543   : > { %2681 = vst [vmem:[%s245_s15] sm:$0xff] %v4133_v35  ;;  %v3725_v9 = vpop.f32.mrb[18].mxu0 }
 0x544   : > { %v4134_v1 = vadd.f32 %v3725_v9, %v2869_v18  ;;  %v2647_v5 = vpop.f32.mrb[19].mxu0 }
 0x545   : > { %v4135_v11 = vadd.f32 %v2869_v18, %v2647_v5 }
 0x546   : > { %2684 = vst [vmem:[%s245_s15 + $0x18] sm:$0xff] %v4134_v1 }
 0x547   : > { %2683 = vst [vmem:[%s245_s15 + $0x10] sm:$0xff] %v4135_v11 }
 0x548   : > { %4298 = shalt.err (!%p4295_p3)
}
 0x549   : > { %s4299_s10 = scalar_lea.hbm %s5737_s20, 1024  ;;  %s4303_s13 = scalar_lea.hbm %s5790_s6, 2048 }
 0x54a   : > { %p4300_p4 = scmp.ne.s32.totalorder %s5737_s20, %s4299_s10  ;;  %p4304_p9 = scmp.lt.u32.totalorder %s5737_s20, %s5790_s6 }
 0x54b   : > { %p4305_p10 = scmp.lt.u32.totalorder %s4303_s13, %s4299_s10  ;;  %p4307_p12 = scmp.lt.u32.totalorder %s4299_s10, %s5737_s20 }
 0x54c   : > { %p4301_p7 = pnand %p4300_p4, %p4429_p5 }
 0x54d   : > { %p4306_p11 = por %p4305_p10, %p4304_p9 }
 0x54e   : > { %p4302_p8 = pneg %p4301_p7 }
 0x54f   : > { %p4308_p13 = por %p4307_p12, %p4306_p11 }
 0x551   : > { %p4309_p0 = pnand %p4308_p13, %p4302_p8 }
 0x553   : > { %4312 = shalt.err (!%p4309_p0)
}
 0x554   : > { %s4354_s16 = smov 128   ;;  %s4355_s18 = smov 8  }
 0x555   : > { %4220 = dma.vmem_to_hbm [thread:$0]  (%p4429_p5), %s5739_s17, 1024, %s5737_s20, %s5743_s25, %s4354_s16, %s4354_s16, %s4355_s18  }
 0x556 PF: > { %p4226_p1 = scmp.ge.s32.totalorder %s4347_s24, 2  ;;  %s2718_s19 = sand.u32 1, %s4335_s21  }
 0x557   : > { %s2719_s26 = scalar_lea.sflag [#allocation3], %s2718_s19 }
 0x558   : > { %p4223_p2 = pnand %p4226_p1, %p4433_p6 }
 0x55a   : > { %4330 = dma.done.wait (!%p4223_p2), %s2719_s26, 1024  }
 0x55b   : > { %4332 = vsyncadd (!%p4223_p2), %s2719_s26, 4294966272  ;;  %p16_p3 = scmp.ge.s32.totalorder %s4416_s27, 4   ;;  %s5877_s21 = smov %s4339_s22 }
 0x55c   : > { %s5878_s22 = smov %s4343_s23  ;;  %s5879_s23 = smov %s4427_s30 }
 0x55d   : > { %s5880_s24 = smov %s4416_s27  ;;  %18 = sbr.rel (!%p16_p3) target bundleno = 3 (0x3), region = 79 }
 0x564   :  { %2724 = vsyncpa [#allocation3], 1 }
 0x565   :  { %2726 = vsyncpa [#allocation3 + $0x1], 1 }

</bundles_post_ra>
